<compile_context>
chip_gen: v6e
topology: v6e:2x2x1
jax: 0.10.0
libtpu: 0.0.40
codegen_flags: <defaults>
</compile_context>

<pallas_src>
import jax
import jax.numpy as jnp
from jax.experimental import pallas as pl
from jax.experimental.pallas import tpu as pltpu
import numpy as np


def _mlp_encoder_kernel(inp_ref, k1_ref, b1_ref, k2_ref, b2wa_ref,
                        madj_ref, wa_ref, x_out_ref, logits_out_ref):
    # inp: (TB, D*X) — whole batch tile, node dim folded into the lane axis.
    h1 = jnp.dot(inp_ref[...], k1_ref[...],
                 preferred_element_type=jnp.float32) + b1_ref[...]
    h1 = jnp.maximum(h1, 0.0)                                   # ReLU

    # fc2 with Wa folded into the bias: xw == x + Wa, shape (TB, D*O).
    xw = jnp.dot(h1, k2_ref[...],
                 preferred_element_type=jnp.float32) + b2wa_ref[...]

    # kron(sinh(3A), I_O) applies A1^T to every sample in one wide matmul.
    adj = jnp.dot(xw, madj_ref[...], preferred_element_type=jnp.float32)

    x = xw - wa_ref[...]                                        # recover x
    x_out_ref[...] = x.astype(x_out_ref.dtype)
    # logits = (I - A1^T)(x + Wa) - Wa  ==  x - A1^T (x + Wa)   (identity fused)
    logits_out_ref[...] = (x - adj).astype(logits_out_ref.dtype)


def _choose_batch_tile(b):
    for tb in (512, 256, 128, 64, 32, 16, 8):
        if b >= tb:
            return tb
    return 8


def mlp_encoder_forward(inputs, params):
    """Pallas implementation of MLPEncoder.forward.

    inputs: [B, D, X] float32  (batch, n_in, n_xdims)
    Returns the same 8-tuple as the PyTorch module:
      (x, logits, adj_A1, adj_A_eye, z, z_positive, adj_A, Wa)
    """
    B, D, X = inputs.shape
    w1, b1 = params["fc1_w"], params["fc1_b"]        # (H, X), (H,)
    w2, b2 = params["fc2_w"], params["fc2_b"]        # (O, H), (O,)
    adj_A = params["adj_A"]                          # (D, D)
    wa = params["Wa"]                                # (O,)
    H = w1.shape[0]
    O = w2.shape[0]
    f32 = jnp.float32

    # ---- batch-invariant precompute (hoisted out of the kernel) -------------
    adj_A1 = jnp.sinh(3.0 * adj_A.astype(f32))                   # (D, D)
    eye_d = jnp.eye(D, dtype=f32)
    k1 = jnp.kron(eye_d, w1.T.astype(f32))                       # (D*X, D*H)
    k2 = jnp.kron(eye_d, w2.T.astype(f32))                       # (D*H, D*O)
    madj = jnp.kron(adj_A1, jnp.eye(O, dtype=f32))               # (D*O, D*O)
    b1_t = jnp.tile(b1.astype(f32), D).reshape(1, D * H)
    wa_t = jnp.tile(wa.astype(f32), D).reshape(1, D * O)
    b2wa_t = jnp.tile((b2 + wa).astype(f32), D).reshape(1, D * O)  # Wa folded

    # ---- flatten per-sample layout and pad batch to the tile ----------------
    TB = _choose_batch_tile(B)
    Bp = ((B + TB - 1) // TB) * TB
    x2 = inputs.astype(f32).reshape(B, D * X)
    if Bp != B:
        x2 = jnp.pad(x2, ((0, Bp - B), (0, 0)))

    const2d = lambda b: (0, 0)   # resident operands: not re-DMAed per step
    x_flat, logits_flat = pl.pallas_call(
        _mlp_encoder_kernel,
        grid=(Bp // TB,),
        in_specs=[
            pl.BlockSpec((TB, D * X), lambda b: (b, 0)),   # inputs tile
            pl.BlockSpec((D * X, D * H), const2d),         # kron(I, W1^T)
            pl.BlockSpec((1, D * H), const2d),             # tiled b1
            pl.BlockSpec((D * H, D * O), const2d),         # kron(I, W2^T)
            pl.BlockSpec((1, D * O), const2d),             # tiled (b2 + Wa)
            pl.BlockSpec((D * O, D * O), const2d),         # kron(sinh(3A), I)
            pl.BlockSpec((1, D * O), const2d),             # tiled Wa
        ],
        out_specs=[
            pl.BlockSpec((TB, D * O), lambda b: (b, 0)),   # x
            pl.BlockSpec((TB, D * O), lambda b: (b, 0)),   # logits
        ],
        out_shape=[
            jax.ShapeDtypeStruct((Bp, D * O), f32),
            jax.ShapeDtypeStruct((Bp, D * O), f32),
        ],
        compiler_params=pltpu.CompilerParams(
            dimension_semantics=("parallel",)),            # batch tiles independent
    )(x2, k1, b1_t, k2, b2wa_t, madj, wa_t)

    x_out = x_flat[:B].reshape(B, D, O)
    logits_out = logits_flat[:B].reshape(B, D, O)
    return (x_out, logits_out, adj_A1, eye_d,
            params["z"], params["z_positive"], adj_A, wa)


def _reference_forward(inputs, params):
    """Plain-JAX reference for correctness check."""
    w1, b1 = params["fc1_w"], params["fc1_b"]
    w2, b2 = params["fc2_w"], params["fc2_b"]
    adj_A, wa = params["adj_A"], params["Wa"]
    adj_A1 = jnp.sinh(3.0 * adj_A)
    adj_forz = jnp.eye(adj_A.shape[0], dtype=jnp.float32) - adj_A1.T
    h1 = jax.nn.relu(jnp.einsum("bdx,hx->bdh", inputs, w1) + b1)
    x = jnp.einsum("bdh,oh->bdo", h1, w2) + b2
    logits = jnp.einsum("ij,bjo->bio", adj_forz, x + wa) - wa
    return x, logits, adj_A1


def make_params(key, n_in, n_xdims, n_hid, n_out, tol=0.1):
    k1, k2, k3, k4, k5 = jax.random.split(key, 5)
    xavier = lambda k, fan_out, fan_in: (
        jax.random.normal(k, (fan_out, fan_in), jnp.float32)
        * np.sqrt(2.0 / (fan_in + fan_out)))
    return {
        "adj_A": 0.1 * jax.random.normal(k5, (n_in, n_in), jnp.float32),
        "Wa": jnp.zeros((n_out,), jnp.float32),
        "fc1_w": xavier(k1, n_hid, n_xdims),
        "fc1_b": jax.random.uniform(k2, (n_hid,), jnp.float32,
                                    -1.0 / np.sqrt(n_xdims), 1.0 / np.sqrt(n_xdims)),
        "fc2_w": xavier(k3, n_out, n_hid),
        "fc2_b": jax.random.uniform(k4, (n_out,), jnp.float32,
                                    -1.0 / np.sqrt(n_hid), 1.0 / np.sqrt(n_hid)),
        "z": jnp.float32(tol),
        "z_positive": jnp.ones((n_in, n_in), jnp.float32),
    }


if __name__ == "__main__":
    # batch, n_in (nodes), n_xdims, n_hid, n_out  -> D*O = 128 (lane-dense out)
    B, D, X, H, O = 512, 8, 8, 32, 16

    key = jax.random.PRNGKey(0)
    kp, kx = jax.random.split(key)
    params = make_params(kp, D, X, H, O)
    inputs = jax.random.normal(kx, (B, D, X), jnp.float32)
    # rel_rec / rel_send are accepted by the PyTorch forward but never used.

    fwd = jax.jit(mlp_encoder_forward)
    outs = jax.block_until_ready(fwd(inputs, params))

    x_ref, logits_ref, adj_A1_ref = _reference_forward(inputs, params)
    np.testing.assert_allclose(np.asarray(outs[0]), np.asarray(x_ref),
                               rtol=1e-5, atol=1e-5)
    np.testing.assert_allclose(np.asarray(outs[1]), np.asarray(logits_ref),
                               rtol=1e-5, atol=1e-5)
    np.testing.assert_allclose(np.asarray(outs[2]), np.asarray(adj_A1_ref),
                               rtol=1e-5, atol=1e-5)

    print("KERNEL_OK")
</pallas_src>

<mosaic_0001>
module attributes {stable_mosaic.version = 11 : i64} {
  func.func @_mlp_encoder_kernel(%arg0: i32, %arg1: memref<512x64xf32, #tpu.memory_space<vmem>>, %arg2: memref<64x256xf32, #tpu.memory_space<vmem>>, %arg3: memref<1x256xf32, #tpu.memory_space<vmem>>, %arg4: memref<256x128xf32, #tpu.memory_space<vmem>>, %arg5: memref<1x128xf32, #tpu.memory_space<vmem>>, %arg6: memref<128x128xf32, #tpu.memory_space<vmem>>, %arg7: memref<1x128xf32, #tpu.memory_space<vmem>>, %arg8: memref<512x128xf32, #tpu.memory_space<vmem>>, %arg9: memref<512x128xf32, #tpu.memory_space<vmem>>) attributes {dimension_semantics = [#tpu.dimension_semantics<parallel>], iteration_bounds = array<i64: 1>, scalar_prefetch = 0 : i64, scratch_operands = 0 : i64, tpu.core_type = #tpu.core_type<tc>, window_params = [{transform_indices = @transform_0, window_bounds = array<i64: 512, 64>}, {pipeline_mode = #tpu.pipeline_mode<synchronous>, transform_indices = @transform_1, window_bounds = array<i64: 64, 256>}, {pipeline_mode = #tpu.pipeline_mode<synchronous>, transform_indices = @transform_2, window_bounds = array<i64: 1, 256>}, {pipeline_mode = #tpu.pipeline_mode<synchronous>, transform_indices = @transform_3, window_bounds = array<i64: 256, 128>}, {pipeline_mode = #tpu.pipeline_mode<synchronous>, transform_indices = @transform_4, window_bounds = array<i64: 1, 128>}, {pipeline_mode = #tpu.pipeline_mode<synchronous>, transform_indices = @transform_5, window_bounds = array<i64: 128, 128>}, {pipeline_mode = #tpu.pipeline_mode<synchronous>, transform_indices = @transform_6, window_bounds = array<i64: 1, 128>}, {transform_indices = @transform_7, window_bounds = array<i64: 512, 128>}, {transform_indices = @transform_8, window_bounds = array<i64: 512, 128>}]} {
    %c0 = arith.constant 0 : index
    %c0_0 = arith.constant 0 : index
    %0 = vector.load %arg1[%c0, %c0_0] : memref<512x64xf32, #tpu.memory_space<vmem>>, vector<512x64xf32>
    %c0_1 = arith.constant 0 : index
    %c0_2 = arith.constant 0 : index
    %1 = vector.load %arg2[%c0_1, %c0_2] : memref<64x256xf32, #tpu.memory_space<vmem>>, vector<64x256xf32>
    %cst = arith.constant dense<0.000000e+00> : vector<512x256xf32>
    %2 = tpu.matmul %0, %1, %cst {dimension_numbers = #tpu.dot_dimension_numbers<[1], [0], [0], [1], [0, 0, 1, 1], [], []>} : vector<512x64xf32>, vector<64x256xf32>, vector<512x256xf32> -> vector<512x256xf32>
    %c0_3 = arith.constant 0 : index
    %c0_4 = arith.constant 0 : index
    %3 = vector.load %arg3[%c0_3, %c0_4] : memref<1x256xf32, #tpu.memory_space<vmem>>, vector<1x256xf32>
    %4 = vector.broadcast %3 : vector<1x256xf32> to vector<512x256xf32>
    %5 = arith.addf %2, %4 : vector<512x256xf32>
    %cst_5 = arith.constant 0.000000e+00 : f32
    %6 = vector.broadcast %cst_5 : f32 to vector<512x256xf32>
    %7 = arith.maximumf %5, %6 : vector<512x256xf32>
    %c0_6 = arith.constant 0 : index
    %c0_7 = arith.constant 0 : index
    %8 = vector.load %arg4[%c0_6, %c0_7] : memref<256x128xf32, #tpu.memory_space<vmem>>, vector<256x128xf32>
    %cst_8 = arith.constant dense<0.000000e+00> : vector<512x128xf32>
    %9 = tpu.matmul %7, %8, %cst_8 {dimension_numbers = #tpu.dot_dimension_numbers<[1], [0], [0], [1], [0, 0, 1, 1], [], []>} : vector<512x256xf32>, vector<256x128xf32>, vector<512x128xf32> -> vector<512x128xf32>
    %c0_9 = arith.constant 0 : index
    %c0_10 = arith.constant 0 : index
    %10 = vector.load %arg5[%c0_9, %c0_10] : memref<1x128xf32, #tpu.memory_space<vmem>>, vector<1x128xf32>
    %11 = vector.broadcast %10 : vector<1x128xf32> to vector<512x128xf32>
    %12 = arith.addf %9, %11 : vector<512x128xf32>
    %c0_11 = arith.constant 0 : index
    %c0_12 = arith.constant 0 : index
    %13 = vector.load %arg6[%c0_11, %c0_12] : memref<128x128xf32, #tpu.memory_space<vmem>>, vector<128x128xf32>
    %cst_13 = arith.constant dense<0.000000e+00> : vector<512x128xf32>
    %14 = tpu.matmul %12, %13, %cst_13 {dimension_numbers = #tpu.dot_dimension_numbers<[1], [0], [0], [1], [0, 0, 1, 1], [], []>} : vector<512x128xf32>, vector<128x128xf32>, vector<512x128xf32> -> vector<512x128xf32>
    %c0_14 = arith.constant 0 : index
    %c0_15 = arith.constant 0 : index
    %15 = vector.load %arg7[%c0_14, %c0_15] : memref<1x128xf32, #tpu.memory_space<vmem>>, vector<1x128xf32>
    %16 = vector.broadcast %15 : vector<1x128xf32> to vector<512x128xf32>
    %17 = arith.subf %12, %16 : vector<512x128xf32>
    %c0_16 = arith.constant 0 : index
    %c0_17 = arith.constant 0 : index
    %18 = vector.load %arg8[%c0_16, %c0_17] : memref<512x128xf32, #tpu.memory_space<vmem>>, vector<512x128xf32>
    tpu.vector_store %arg8[%c0_16, %c0_17], %17 {strides = array<i32>} : memref<512x128xf32, #tpu.memory_space<vmem>>, vector<512x128xf32>,
    %19 = arith.subf %17, %14 : vector<512x128xf32>
    %c0_18 = arith.constant 0 : index
    %c0_19 = arith.constant 0 : index
    %20 = vector.load %arg9[%c0_18, %c0_19] : memref<512x128xf32, #tpu.memory_space<vmem>>, vector<512x128xf32>
    tpu.vector_store %arg9[%c0_18, %c0_19], %19 {strides = array<i32>} : memref<512x128xf32, #tpu.memory_space<vmem>>, vector<512x128xf32>,
    return
  }
  func.func @transform_0(%arg0: i32) -> (i32, i32) {
    %c0_i32 = arith.constant 0 : i32
    %c0_i32_0 = arith.constant 0 : i32
    return %arg0, %c0_i32 : i32, i32
  }
  func.func @transform_1(%arg0: i32) -> (i32, i32) {
    %c0_i32 = arith.constant 0 : i32
    %c0_i32_0 = arith.constant 0 : i32
    %c0_i32_1 = arith.constant 0 : i32
    return %c0_i32, %c0_i32_0 : i32, i32
  }
  func.func @transform_2(%arg0: i32) -> (i32, i32) {
    %c0_i32 = arith.constant 0 : i32
    %c0_i32_0 = arith.constant 0 : i32
    %c0_i32_1 = arith.constant 0 : i32
    return %c0_i32, %c0_i32_0 : i32, i32
  }
  func.func @transform_3(%arg0: i32) -> (i32, i32) {
    %c0_i32 = arith.constant 0 : i32
    %c0_i32_0 = arith.constant 0 : i32
    %c0_i32_1 = arith.constant 0 : i32
    return %c0_i32, %c0_i32_0 : i32, i32
  }
  func.func @transform_4(%arg0: i32) -> (i32, i32) {
    %c0_i32 = arith.constant 0 : i32
    %c0_i32_0 = arith.constant 0 : i32
    %c0_i32_1 = arith.constant 0 : i32
    return %c0_i32, %c0_i32_0 : i32, i32
  }
  func.func @transform_5(%arg0: i32) -> (i32, i32) {
    %c0_i32 = arith.constant 0 : i32
    %c0_i32_0 = arith.constant 0 : i32
    %c0_i32_1 = arith.constant 0 : i32
    return %c0_i32, %c0_i32_0 : i32, i32
  }
  func.func @transform_6(%arg0: i32) -> (i32, i32) {
    %c0_i32 = arith.constant 0 : i32
    %c0_i32_0 = arith.constant 0 : i32
    %c0_i32_1 = arith.constant 0 : i32
    return %c0_i32, %c0_i32_0 : i32, i32
  }
  func.func @transform_7(%arg0: i32) -> (i32, i32) {
    %c0_i32 = arith.constant 0 : i32
    %c0_i32_0 = arith.constant 0 : i32
    return %arg0, %c0_i32 : i32, i32
  }
  func.func @transform_8(%arg0: i32) -> (i32, i32) {
    %c0_i32 = arith.constant 0 : i32
    %c0_i32_0 = arith.constant 0 : i32
    return %arg0, %c0_i32 : i32, i32
  }
}

</mosaic_0001>

<bundles_post_ra>
// kernel: tile.18
= control target key start
LH: loop header
LB: loop body
LE: loop exit
PB: predicated region body
PF: predicated region fallthrough
CT: control target
= control target key end

     0   :  { %s22_s0 = inlined_call_operand.vmem [shape: f32[32], index: 0, kind: input, shape index: {}]   ;;  %s23_s1 = inlined_call_operand.vmem [shape: f32[8,32], index: 1, kind: output, shape index: {}]  }
   0x1   :  { %v4_v0 = vld [vmem:[%s22_s0] ss:$0 sm:$0xff] }
   0x2   :  { %5 = vst [vmem:[%s23_s1] sm:$0xff] %v4_v0 }

// kernel: tile.19
= control target key start
LH: loop header
LB: loop body
LE: loop exit
PB: predicated region body
PF: predicated region fallthrough
CT: control target
= control target key end

     0   :  { %s7_s6 = smov 3  ;;  %s14_s9 = smov 3  ;;  %vm4_vm0 = vcmask 261120   ;;  %vm11_vm1 = vcmask 1048320   ;;  %vm18_vm2 = vcmask 785920   ;;  %vm25_vm3 = vcmask 523520   ;;  %s79_s0 = inlined_call_operand.vmem [shape: f32[8,32], index: 0, kind: input, shape index: {}]   ;;  %s80_s1 = inlined_call_operand.vmem [shape: f32[1,256], index: 1, kind: output, shape index: {}]  }
   0x1   :  { %v41_v0 = vld [vmem:[%s79_s0 + $0x3] ss:$4 sm:%s7_s6]   ;;  %s48_s10 = smov 96   ;;  %s21_s11 = smov 3  ;;  %v42_v1 = vld [vmem:[%s79_s0 + $0x2] ss:$4 sm:%s14_s9]  }
   0x2   :  { %9 = vrot.lane.b32.xlu0 %v41_v0, %s48_s10  ;;  %v43_v2 = vld [vmem:[%s79_s0 + $0x1] ss:$4 sm:%s21_s11]   ;;  %s2_s16 = smov 3  ;;  %s49_s17 = smov 32  }
   0x3   :  { %23 = vrot.lane.b32.xlu1 %v43_v2, %s49_s17  ;;  %v3_v3 = vld [vmem:[%s79_s0] ss:$4 sm:%s2_s16]   ;;  %s50_s0 = smov 64  }
   0x4   :  { %5 = vst.msk [vmem:[#allocation0] ss:$8 sm:$0x3] %vm4_vm0, %v3_v3  }
   0x6   :  { %16 = vrot.lane.b32.xlu0 %v42_v1, %s50_s0 }
  0x74   :  { %v10_v4 = vpop.permute.xlu0 %9  }
  0x75   :  { %12 = vst.msk [vmem:[#allocation0] ss:$8 sm:$0x3] %vm11_vm1, %v10_v4   ;;  %v24_v5 = vpop.permute.xlu1 %23  }
  0x78   :  { %v17_v6 = vpop.permute.xlu0 %16  }
  0x79   :  { %19 = vst.msk [vmem:[#allocation0] ss:$8 sm:$0x3] %vm18_vm2, %v17_v6  }
  0x7a   :  { %26 = vst.msk [vmem:[#allocation0] ss:$8 sm:$0x3] %vm25_vm3, %v24_v5  }
  0x81   :  { %v31_v7 = vld [vmem:[#allocation0] sm:$0x1]  ;;  %v36_v8 = vld [vmem:[#allocation0 + $0x8] sm:$0x1] }
  0x82   :  { %34 = vst [vmem:[%s80_s1] sm:$0x1] %v31_v7  ;;  %44 = vst [vmem:[%s80_s1 + $0x1] sm:$0x1] %v36_v8 }

// kernel: tile.28
= control target key start
LH: loop header
LB: loop body
LE: loop exit
PB: predicated region body
PF: predicated region fallthrough
CT: control target
= control target key end

     0   :  { %s22_s0 = inlined_call_operand.vmem [shape: f32[16], index: 0, kind: input, shape index: {}]   ;;  %s23_s1 = inlined_call_operand.vmem [shape: f32[8,16], index: 1, kind: output, shape index: {}]  }
   0x1   :  { %v4_v0 = vld [vmem:[%s22_s0] ss:$0 sm:$0xff] }
   0x2   :  { %5 = vst [vmem:[%s23_s1] sm:$0xff] %v4_v0 }

// kernel: tile.29
= control target key start
LH: loop header
LB: loop body
LE: loop exit
PB: predicated region body
PF: predicated region fallthrough
CT: control target
= control target key end

     0   :  { %s69_s10 = smov 112   ;;  %s70_s11 = smov 80   ;;  %vm3_vm0 = vcmask 130048   ;;  %vm9_vm1 = vcmask 1048448   ;;  %vm15_vm2 = vcmask 917248   ;;  %vm21_vm3 = vcmask 786048   ;;  %s113_s0 = inlined_call_operand.vmem [shape: f32[8,16], index: 0, kind: input, shape index: {}]   ;;  %s114_s1 = inlined_call_operand.vmem [shape: f32[1,128], index: 1, kind: output, shape index: {}]  }
   0x1   :  { %v55_v0 = vld [vmem:[%s113_s0 + $0x7] sm:$0x1]   ;;  %v57_v1 = vld [vmem:[%s113_s0 + $0x5] sm:$0x1]   ;;  %v56_v2 = vld [vmem:[%s113_s0 + $0x6] sm:$0x1]  }
   0x2   :  { %7 = vrot.lane.b32.xlu0 %v55_v0, %s69_s10  ;;  %19 = vrot.lane.b32.xlu1 %v57_v1, %s70_s11  ;;  %v58_v3 = vld [vmem:[%s113_s0 + $0x4] sm:$0x1]   ;;  %v2_v4 = vld [vmem:[%s113_s0] sm:$0x1]   ;;  %s71_s18 = smov 96   ;;  %s72_s19 = smov 64  }
   0x3   :  { %4 = vst.msk [vmem:[#allocation0] sm:$0x1] %vm3_vm0, %v2_v4   ;;  %v59_v5 = vld [vmem:[%s113_s0 + $0x3] sm:$0x1]   ;;  %v60_v6 = vld [vmem:[%s113_s0 + $0x2] sm:$0x1]  }
   0x4   :  { %s73_s24 = smov 48   ;;  %s74_s25 = smov 32   ;;  %v61_v7 = vld [vmem:[%s113_s0 + $0x1] sm:$0x1]   ;;  %vm27_vm4 = vcmask 654848   ;;  %vm33_vm5 = vcmask 523648  }
   0x5   :  { %s75_s0 = smov 16   ;;  %vm39_vm6 = vcmask 392448   ;;  %vm45_vm7 = vcmask 261248  }
   0x6   :  { %13 = vrot.lane.b32.xlu0 %v56_v2, %s71_s18  ;;  %25 = vrot.lane.b32.xlu1 %v58_v3, %s72_s19 }
   0xa   :  { %31 = vrot.lane.b32.xlu0 %v59_v5, %s73_s24  ;;  %37 = vrot.lane.b32.xlu1 %v60_v6, %s74_s25 }
   0xe   :  { %43 = vrot.lane.b32.xlu0 %v61_v7, %s75_s0 }
  0x74   :  { %v8_v8 = vpop.permute.xlu0 %7   ;;  %v20_v9 = vpop.permute.xlu1 %19  }
  0x75   :  { %10 = vst.msk [vmem:[#allocation0] sm:$0x1] %vm9_vm1, %v8_v8  }
  0x78   :  { %v14_v10 = vpop.permute.xlu0 %13   ;;  %v26_v11 = vpop.permute.xlu1 %25  }
  0x79   :  { %16 = vst.msk [vmem:[#allocation0] sm:$0x1] %vm15_vm2, %v14_v10  }
  0x7a   :  { %22 = vst.msk [vmem:[#allocation0] sm:$0x1] %vm21_vm3, %v20_v9  }
  0x7b   :  { %28 = vst.msk [vmem:[#allocation0] sm:$0x1] %vm27_vm4, %v26_v11  }
  0x7c   :  { %v32_v12 = vpop.permute.xlu0 %31   ;;  %v38_v13 = vpop.permute.xlu1 %37  }
  0x7d   :  { %34 = vst.msk [vmem:[#allocation0] sm:$0x1] %vm33_vm5, %v32_v12  }
  0x7e   :  { %40 = vst.msk [vmem:[#allocation0] sm:$0x1] %vm39_vm6, %v38_v13  }
  0x80   :  { %v44_v14 = vpop.permute.xlu0 %43  }
  0x81   :  { %46 = vst.msk [vmem:[#allocation0] sm:$0x1] %vm45_vm7, %v44_v14  }
  0x88   :  { %v51_v15 = vld [vmem:[#allocation0] sm:$0x1] }
  0x89   :  { %54 = vst [vmem:[%s114_s1] sm:$0x1] %v51_v15 }

// kernel: mlp_encoder_forward.1
= control target key start
LH: loop header
LB: loop body
LE: loop exit
PB: predicated region body
PF: predicated region fallthrough
CT: control target
= control target key end

     0   :  { %v2279_v3 = vmov 0.0   ;;  %vm120_vm0 = vcmask 523264   ;;  %s3882_s1 = inlined_call_operand.vmem [shape: f32[64,256], index: 1, kind: input, shape index: {}]   ;;  %s3883_s0 = inlined_call_operand.vmem [shape: f32[512,64], index: 0, kind: input, shape index: {}]   ;;  %s3884_s3 = inlined_call_operand.vmem [shape: f32[256,128], index: 3, kind: input, shape index: {}]   ;;  %s3885_s2 = inlined_call_operand.vmem [shape: f32[1,256], index: 2, kind: input, shape index: {}]   ;;  %s3886_s5 = inlined_call_operand.vmem [shape: f32[128,128], index: 5, kind: input, shape index: {}]   ;;  %s3887_s4 = inlined_call_operand.vmem [shape: f32[1,128], index: 4, kind: input, shape index: {}]   ;;  %s3888_s6 = inlined_call_operand.vmem [shape: f32[1,128], index: 6, kind: input, shape index: {}]   ;;  %s3889_s7 = inlined_call_operand.vmem [shape: f32[512,128], index: 7, kind: output, shape index: {0}]   ;;  %s3890_s8 = inlined_call_operand.vmem [shape: f32[512,128], index: 8, kind: output, shape index: {1}]  }
   0x1   :  { %v107_v0 = vld [vmem:[%s3882_s1 + $0x78] sm:$0xff]  ;;  %v106_v1 = vld [vmem:[%s3882_s1 + $0x70] sm:$0xff]  ;;  %v105_v2 = vld [vmem:[%s3882_s1 + $0x68] sm:$0xff]  ;;  %377 = vmatprep.mubr.f32.mxu0 %v2279_v3  ;;  %665 = vmatprep.mubr.f32.mxu1 %v2279_v3 }
   0x2   :  { %329 = vmatprep.subr.mxu0 %v107_v0  ;;  %v104_v4 = vld [vmem:[%s3882_s1 + $0x60] sm:$0xff]  ;;  %2260 = vmatprep.subr.mxu1 %v107_v0  ;;  %v103_v5 = vld [vmem:[%s3882_s1 + $0x58] sm:$0xff]  ;;  %v102_v6 = vld [vmem:[%s3882_s1 + $0x50] sm:$0xff] }
   0x3   :  { %330 = vmatpush1.msra.mxu0 %v106_v1  ;;  %2268 = vmatpush1.msra.mxu1 %v106_v1  ;;  %v101_v7 = vld [vmem:[%s3882_s1 + $0x48] sm:$0xff]  ;;  %v100_v8 = vld [vmem:[%s3882_s1 + $0x40] sm:$0xff]  ;;  %v99_v9 = vld [vmem:[%s3882_s1 + $0x38] sm:$0xff] }
   0x4   :  { %331 = vmatprep.subr.mxu0 %v105_v2  ;;  %2261 = vmatprep.subr.mxu1 %v105_v2  ;;  %v98_v10 = vld [vmem:[%s3882_s1 + $0x30] sm:$0xff]  ;;  %v97_v11 = vld [vmem:[%s3882_s1 + $0x28] sm:$0xff]  ;;  %v96_v12 = vld [vmem:[%s3882_s1 + $0x20] sm:$0xff] }
   0x5   :  { %332 = vmatpush1.msra.mxu0 %v104_v4  ;;  %2269 = vmatpush1.msra.mxu1 %v104_v4  ;;  %v95_v13 = vld [vmem:[%s3882_s1 + $0x18] sm:$0xff]  ;;  %v94_v14 = vld [vmem:[%s3882_s1 + $0x10] sm:$0xff]  ;;  %v93_v15 = vld [vmem:[%s3882_s1 + $0x8] sm:$0xff] }
   0x6   :  { %333 = vmatprep.subr.mxu0 %v103_v5  ;;  %2262 = vmatprep.subr.mxu1 %v103_v5  ;;  %v92_v16 = vld [vmem:[%s3882_s1] sm:$0xff]  ;;  %v29_v18 = vld [vmem:[%s3883_s0 + $0x8] sm:$0xff]  ;;  %v30_v20 = vld [vmem:[%s3883_s0 + $0x10] sm:$0xff] }
   0x7   :  { %334 = vmatpush1.msra.mxu0 %v102_v6  ;;  %2270 = vmatpush1.msra.mxu1 %v102_v6  ;;  %v28_v17 = vld [vmem:[%s3883_s0] sm:$0xff]  ;;  %v905_v21 = vld [vmem:[%s3884_s3 + $0x78] sm:$0xff]  ;;  %v77_v22 = vld [vmem:[%s3883_s0 + $0x188] sm:$0xff] }
   0x8   :  { %335 = vmatprep.subr.mxu0 %v101_v7  ;;  %2263 = vmatprep.subr.mxu1 %v101_v7  ;;  %v76_v19 = vld [vmem:[%s3883_s0 + $0x180] sm:$0xff]  ;;  %v904_v23 = vld [vmem:[%s3884_s3 + $0x70] sm:$0xff]  ;;  %v31_v24 = vld [vmem:[%s3883_s0 + $0x18] sm:$0xff] }
   0x9   :  { %336 = vmatpush1.msra.mxu0 %v100_v8  ;;  %2271 = vmatpush1.msra.mxu1 %v100_v8  ;;  %v903_v25 = vld [vmem:[%s3884_s3 + $0x68] sm:$0xff]  ;;  %v78_v26 = vld [vmem:[%s3883_s0 + $0x190] sm:$0xff]  ;;  %v902_v27 = vld [vmem:[%s3884_s3 + $0x60] sm:$0xff] }
   0xa   :  { %337 = vmatprep.subr.mxu0 %v99_v9  ;;  %2264 = vmatprep.subr.mxu1 %v99_v9  ;;  %v32_v28 = vld [vmem:[%s3883_s0 + $0x20] sm:$0xff]  ;;  %v901_v29 = vld [vmem:[%s3884_s3 + $0x58] sm:$0xff]  ;;  %v900_v31 = vld [vmem:[%s3884_s3 + $0x50] sm:$0xff] }
   0xb   :  { %338 = vmatpush1.msra.mxu0 %v98_v10  ;;  %2272 = vmatpush1.msra.mxu1 %v98_v10  ;;  %v79_v30 = vld [vmem:[%s3883_s0 + $0x198] sm:$0xff]  ;;  %v33_v32 = vld [vmem:[%s3883_s0 + $0x28] sm:$0xff]  ;;  %v80_v34 = vld [vmem:[%s3883_s0 + $0x1a0] sm:$0xff] }
   0xc   :  { %339 = vmatprep.subr.mxu0 %v97_v11  ;;  %2265 = vmatprep.subr.mxu1 %v97_v11  ;;  %v899_v33 = vld [vmem:[%s3884_s3 + $0x48] sm:$0xff]  ;;  %v898_v35 = vld [vmem:[%s3884_s3 + $0x40] sm:$0xff]  ;;  %v34_v36 = vld [vmem:[%s3883_s0 + $0x30] sm:$0xff] }
   0xd   :  { %340 = vmatpush1.msra.mxu0 %v96_v12  ;;  %2273 = vmatpush1.msra.mxu1 %v96_v12  ;;  %v897_v37 = vld [vmem:[%s3884_s3 + $0x38] sm:$0xff]  ;;  %v81_v38 = vld [vmem:[%s3883_s0 + $0x1a8] sm:$0xff]  ;;  %v896_v39 = vld [vmem:[%s3884_s3 + $0x30] sm:$0xff] }
   0xe   :  { %341 = vmatprep.subr.mxu0 %v95_v13  ;;  %2266 = vmatprep.subr.mxu1 %v95_v13  ;;  %v35_v40 = vld [vmem:[%s3883_s0 + $0x38] sm:$0xff]  ;;  %v895_v41 = vld [vmem:[%s3884_s3 + $0x28] sm:$0xff]  ;;  %v82_v42 = vld [vmem:[%s3883_s0 + $0x1b0] sm:$0xff] }
   0xf   :  { %342 = vmatpush1.msra.mxu0 %v94_v14  ;;  %2274 = vmatpush1.msra.mxu1 %v94_v14  ;;  %v894_v43 = vld [vmem:[%s3884_s3 + $0x20] sm:$0xff]  ;;  %v893_v45 = vld [vmem:[%s3884_s3 + $0x18] sm:$0xff]  ;;  %v892_v47 = vld [vmem:[%s3884_s3 + $0x10] sm:$0xff] }
  0x10   :  { %343 = vmatprep.subr.mxu0 %v93_v15  ;;  %2267 = vmatprep.subr.mxu1 %v93_v15  ;;  %v36_v44 = vld [vmem:[%s3883_s0 + $0x40] sm:$0xff]  ;;  %v83_v46 = vld [vmem:[%s3883_s0 + $0x1b8] sm:$0xff]  ;;  %v37_v48 = vld [vmem:[%s3883_s0 + $0x48] sm:$0xff] }
  0x11   :  { %344 = vmatpush1.msra.mxu0 %v92_v16  ;;  %2275 = vmatpush1.msra.mxu1 %v92_v16  ;;  %v891_v49 = vld [vmem:[%s3884_s3 + $0x8] sm:$0xff]  ;;  %v84_v50 = vld [vmem:[%s3883_s0 + $0x1c0] sm:$0xff]  ;;  %v38_v52 = vld [vmem:[%s3883_s0 + $0x50] sm:$0xff] }
  0x12   :  { %1986 = vmatmul.mubr.msk.f32.vlgmr.msra.gmra.mxu0 %vm120_vm0, %v28_v17  ;;  %929 = vmatprep.subr.mxu1 %v2279_v3  ;;  %v890_v51 = vld [vmem:[%s3884_s3] sm:$0xff]  ;;  %v921_v53 = vld [vmem:[%s3884_s3 + $0xf8] sm:$0xff]  ;;  %v85_v54 = vld [vmem:[%s3883_s0 + $0x1c8] sm:$0xff] }
  0x13   :  { %383 = vmatprep.mubr.f32.mxu0 %v2279_v3  ;;  %2034 = vmatmul.mubr.msk.f32.vlgmr.msra.gmra.mxu1 %vm120_vm0, %v76_v19  ;;  %v920_v55 = vld [vmem:[%s3884_s3 + $0xf0] sm:$0xff]  ;;  %v39_v56 = vld [vmem:[%s3883_s0 + $0x58] sm:$0xff]  ;;  %v919_v57 = vld [vmem:[%s3884_s3 + $0xe8] sm:$0xff] }
  0x14   :  { %671 = vmatprep.mubr.f32.mxu1 %v2279_v3  ;;  %930 = vmatpush1.msra.mxu1 %v905_v21  ;;  %v86_v58 = vld [vmem:[%s3883_s0 + $0x1d0] sm:$0xff]  ;;  %v918_v59 = vld [vmem:[%s3884_s3 + $0xe0] sm:$0xff]  ;;  %v917_v61 = vld [vmem:[%s3884_s3 + $0xd8] sm:$0xff] }
  0x15   :  { %931 = vmatprep.subr.mxu1 %v2279_v3  ;;  %v40_v60 = vld [vmem:[%s3883_s0 + $0x60] sm:$0xff]  ;;  %v87_v62 = vld [vmem:[%s3883_s0 + $0x1d8] sm:$0xff]  ;;  %v916_v63 = vld [vmem:[%s3884_s3 + $0xd0] sm:$0xff] }
  0x16   :  { %1987 = vmatmul.mubr.msk.f32.gmra.mxu0 %vm120_vm0, %v29_v18  ;;  %932 = vmatpush1.msra.mxu1 %v904_v23  ;;  %v41_v0 = vld [vmem:[%s3883_s0 + $0x68] sm:$0xff]  ;;  %v88_v2 = vld [vmem:[%s3883_s0 + $0x1e0] sm:$0xff]  ;;  %v42_v5 = vld [vmem:[%s3883_s0 + $0x70] sm:$0xff] }
  0x17   :  { %389 = vmatprep.mubr.f32.mxu0 %v2279_v3  ;;  %2035 = vmatmul.mubr.msk.f32.gmra.mxu1 %vm120_vm0, %v77_v22  ;;  %v915_v1 = vld [vmem:[%s3884_s3 + $0xc8] sm:$0xff]  ;;  %v914_v4 = vld [vmem:[%s3884_s3 + $0xc0] sm:$0xff]  ;;  %v913_v6 = vld [vmem:[%s3884_s3 + $0xb8] sm:$0xff] }
  0x18   :  { %677 = vmatprep.mubr.f32.mxu1 %v2279_v3  ;;  %933 = vmatprep.subr.mxu1 %v2279_v3  ;;  %v89_v7 = vld [vmem:[%s3883_s0 + $0x1e8] sm:$0xff]  ;;  %v912_v8 = vld [vmem:[%s3884_s3 + $0xb0] sm:$0xff]  ;;  %v43_v9 = vld [vmem:[%s3883_s0 + $0x78] sm:$0xff] }
  0x19   :  { %934 = vmatpush1.msra.mxu1 %v903_v25  ;;  %v911_v10 = vld [vmem:[%s3884_s3 + $0xa8] sm:$0xff]  ;;  %v90_v11 = vld [vmem:[%s3883_s0 + $0x1f0] sm:$0xff]  ;;  %v910_v12 = vld [vmem:[%s3884_s3 + $0xa0] sm:$0xff] }
  0x1a   :  { %1988 = vmatmul.mubr.msk.f32.gmra.mxu0 %vm120_vm0, %v30_v20  ;;  %935 = vmatprep.subr.mxu1 %v2279_v3  ;;  %v44_v13 = vld [vmem:[%s3883_s0 + $0x80] sm:$0xff]  ;;  %v909_v14 = vld [vmem:[%s3884_s3 + $0x98] sm:$0xff]  ;;  %v45_v15 = vld [vmem:[%s3883_s0 + $0x88] sm:$0xff] }
  0x1b   :  { %395 = vmatprep.mubr.f32.mxu0 %v2279_v3  ;;  %2036 = vmatmul.mubr.msk.f32.gmra.mxu1 %vm120_vm0, %v78_v26  ;;  %v91_v16 = vld [vmem:[%s3883_s0 + $0x1f8] sm:$0xff]  ;;  %v908_v17 = vld [vmem:[%s3884_s3 + $0x90] sm:$0xff]  ;;  %v907_v18 = vld [vmem:[%s3884_s3 + $0x88] sm:$0xff] }
  0x1c   :  { %936 = vmatpush1.msra.mxu1 %v902_v27  ;;  %683 = vmatprep.mubr.f32.mxu1 %v2279_v3  ;;  %v46_v19 = vld [vmem:[%s3883_s0 + $0x90] sm:$0xff]  ;;  %v906_v20 = vld [vmem:[%s3884_s3 + $0x80] sm:$0xff]  ;;  %v47_v21 = vld [vmem:[%s3883_s0 + $0x98] sm:$0xff] }
  0x1d   :  { %937 = vmatprep.subr.mxu1 %v2279_v3  ;;  %v48_v22 = vld [vmem:[%s3883_s0 + $0xa0] sm:$0xff]  ;;  %v49_v23 = vld [vmem:[%s3883_s0 + $0xa8] sm:$0xff]  ;;  %v51_v25 = vld [vmem:[%s3883_s0 + $0xb8] sm:$0xff] }
  0x1e   :  { %1989 = vmatmul.mubr.msk.f32.gmra.mxu0 %vm120_vm0, %v31_v24  ;;  %938 = vmatpush1.msra.mxu1 %v901_v29  ;;  %v50_v24 = vld [vmem:[%s3883_s0 + $0xb0] sm:$0xff]  ;;  %v52_v26 = vld [vmem:[%s3883_s0 + $0xc0] sm:$0xff]  ;;  %v53_v27 = vld [vmem:[%s3883_s0 + $0xc8] sm:$0xff] }
  0x1f   :  { %401 = vmatprep.mubr.f32.mxu0 %v2279_v3  ;;  %939 = vmatprep.subr.mxu1 %v2279_v3  ;;  %v55_v29 = vld [vmem:[%s3883_s0 + $0xd8] sm:$0xff] }
  0x20   :  { %2037 = vmatmul.mubr.msk.f32.gmra.mxu1 %vm120_vm0, %v79_v30  ;;  %v56_v30 = vld [vmem:[%s3883_s0 + $0xe0] sm:$0xff] }
  0x21   :  { %940 = vmatpush1.msra.mxu1 %v900_v31  ;;  %689 = vmatprep.mubr.f32.mxu1 %v2279_v3  ;;  %v57_v31 = vld [vmem:[%s3883_s0 + $0xe8] sm:$0xff] }
  0x22   :  { %1990 = vmatmul.mubr.msk.f32.gmra.mxu0 %vm120_vm0, %v32_v28  ;;  %941 = vmatprep.subr.mxu1 %v2279_v3  ;;  %v54_v28 = vld [vmem:[%s3883_s0 + $0xd0] sm:$0xff] }
  0x23   :  { %407 = vmatprep.mubr.f32.mxu0 %v2279_v3  ;;  %942 = vmatpush1.msra.mxu1 %v899_v33  ;;  %v59_v33 = vld [vmem:[%s3883_s0 + $0xf8] sm:$0xff] }
  0x24   :  { %943 = vmatprep.subr.mxu1 %v2279_v3  ;;  %2038 = vmatmul.mubr.msk.f32.gmra.mxu1 %vm120_vm0, %v80_v34  ;;  %v60_v34 = vld [vmem:[%s3883_s0 + $0x100] sm:$0xff] }
  0x25   :  { %944 = vmatpush1.msra.mxu1 %v898_v35  ;;  %695 = vmatprep.mubr.f32.mxu1 %v2279_v3  ;;  %v61_v35 = vld [vmem:[%s3883_s0 + $0x108] sm:$0xff] }
  0x26   :  { %1991 = vmatmul.mubr.msk.f32.gmra.mxu0 %vm120_vm0, %v33_v32  ;;  %945 = vmatprep.subr.mxu1 %v2279_v3  ;;  %v58_v32 = vld [vmem:[%s3883_s0 + $0xf0] sm:$0xff] }
  0x27   :  { %413 = vmatprep.mubr.f32.mxu0 %v2279_v3  ;;  %946 = vmatpush1.msra.mxu1 %v897_v37  ;;  %v63_v37 = vld [vmem:[%s3883_s0 + $0x118] sm:$0xff] }
  0x28   :  { %947 = vmatprep.subr.mxu1 %v2279_v3  ;;  %2039 = vmatmul.mubr.msk.f32.gmra.mxu1 %vm120_vm0, %v81_v38  ;;  %v64_v38 = vld [vmem:[%s3883_s0 + $0x120] sm:$0xff] }
  0x29   :  { %948 = vmatpush1.msra.mxu1 %v896_v39  ;;  %701 = vmatprep.mubr.f32.mxu1 %v2279_v3  ;;  %v65_v39 = vld [vmem:[%s3883_s0 + $0x128] sm:$0xff] }
  0x2a   :  { %1992 = vmatmul.mubr.msk.f32.gmra.mxu0 %vm120_vm0, %v34_v36  ;;  %949 = vmatprep.subr.mxu1 %v2279_v3  ;;  %v62_v36 = vld [vmem:[%s3883_s0 + $0x110] sm:$0xff] }
  0x2b   :  { %419 = vmatprep.mubr.f32.mxu0 %v2279_v3  ;;  %950 = vmatpush1.msra.mxu1 %v895_v41  ;;  %v67_v41 = vld [vmem:[%s3883_s0 + $0x138] sm:$0xff] }
  0x2c   :  { %951 = vmatprep.subr.mxu1 %v2279_v3  ;;  %2040 = vmatmul.mubr.msk.f32.gmra.mxu1 %vm120_vm0, %v82_v42  ;;  %v68_v42 = vld [vmem:[%s3883_s0 + $0x140] sm:$0xff] }
  0x2d   :  { %952 = vmatpush1.msra.mxu1 %v894_v43  ;;  %707 = vmatprep.mubr.f32.mxu1 %v2279_v3  ;;  %v69_v43 = vld [vmem:[%s3883_s0 + $0x148] sm:$0xff] }
  0x2e   :  { %1993 = vmatmul.mubr.msk.f32.gmra.mxu0 %vm120_vm0, %v35_v40  ;;  %953 = vmatprep.subr.mxu1 %v2279_v3  ;;  %v66_v40 = vld [vmem:[%s3883_s0 + $0x130] sm:$0xff] }
  0x2f   :  { %425 = vmatprep.mubr.f32.mxu0 %v2279_v3  ;;  %954 = vmatpush1.msra.mxu1 %v893_v45  ;;  %v71_v45 = vld [vmem:[%s3883_s0 + $0x158] sm:$0xff] }
  0x30   :  { %955 = vmatprep.subr.mxu1 %v2279_v3  ;;  %2041 = vmatmul.mubr.msk.f32.gmra.mxu1 %vm120_vm0, %v83_v46  ;;  %v72_v46 = vld [vmem:[%s3883_s0 + $0x160] sm:$0xff] }
  0x31   :  { %956 = vmatpush1.msra.mxu1 %v892_v47  ;;  %713 = vmatprep.mubr.f32.mxu1 %v2279_v3  ;;  %v73_v47 = vld [vmem:[%s3883_s0 + $0x168] sm:$0xff] }
  0x32   :  { %1994 = vmatmul.mubr.msk.f32.gmra.mxu0 %vm120_vm0, %v36_v44  ;;  %957 = vmatprep.subr.mxu1 %v2279_v3  ;;  %v70_v44 = vld [vmem:[%s3883_s0 + $0x150] sm:$0xff] }
  0x33   :  { %431 = vmatprep.mubr.f32.mxu0 %v2279_v3  ;;  %958 = vmatpush1.msra.mxu1 %v891_v49  ;;  %v74_v49 = vld [vmem:[%s3883_s0 + $0x170] sm:$0xff] }
  0x34   :  { %959 = vmatprep.subr.mxu1 %v2279_v3  ;;  %2042 = vmatmul.mubr.msk.f32.gmra.mxu1 %vm120_vm0, %v84_v50 }
  0x35   :  { %960 = vmatpush1.msra.mxu1 %v890_v51  ;;  %719 = vmatprep.mubr.f32.mxu1 %v2279_v3  ;;  %v75_v51 = vld [vmem:[%s3883_s0 + $0x178] sm:$0xff] }
  0x36   :  { %1995 = vmatmul.mubr.msk.f32.gmra.mxu0 %vm120_vm0, %v37_v48  ;;  %961 = vmatprep.subr.mxu1 %v2279_v3  ;;  %v110_v48 = vlaneseq }
  0x37   :  { %437 = vmatprep.mubr.f32.mxu0 %v2279_v3  ;;  %962 = vmatpush2.msra.mxu1 %v921_v53  ;;  %v108_v53 = vld [vmem:[%s3885_s2] sm:$0x3] }
  0x38   :  { %963 = vmatprep.subr.mxu1 %v2279_v3  ;;  %2043 = vmatmul.mubr.msk.f32.gmra.mxu1 %vm120_vm0, %v85_v54  ;;  %v111_v50 = vshrl.u32 %v110_v48, 7 }
  0x39   :  { %964 = vmatpush2.msra.mxu1 %v920_v55  ;;  %725 = vmatprep.mubr.f32.mxu1 %v2279_v3 }
  0x3a   :  { %1996 = vmatmul.mubr.msk.f32.gmra.mxu0 %vm120_vm0, %v38_v52  ;;  %965 = vmatprep.subr.mxu1 %v2279_v3  ;;  %v112_v52 = vsub.s32 0, %v111_v50  ;;  %v116_v54 = vsub.s32 1, %v111_v50 }
  0x3b   :  { %443 = vmatprep.mubr.f32.mxu0 %v2279_v3  ;;  %966 = vmatpush2.msra.mxu1 %v919_v57 }
  0x3c   :  { %967 = vmatprep.subr.mxu1 %v2279_v3  ;;  %2044 = vmatmul.mubr.msk.f32.gmra.mxu1 %vm120_vm0, %v86_v58  ;;  %v2824_v55 = vrot.slane %v108_v53, %v112_v52 }
  0x3d   :  { %968 = vmatpush2.msra.mxu1 %v918_v59  ;;  %731 = vmatprep.mubr.f32.mxu1 %v2279_v3 }
  0x3e   :  { %1997 = vmatmul.mubr.msk.f32.gmra.mxu0 %vm120_vm0, %v39_v56  ;;  %969 = vmatprep.subr.mxu1 %v2279_v3  ;;  %v2826_v56 = vrot.slane %v108_v53, %v116_v54 }
  0x3f   :  { %449 = vmatprep.mubr.f32.mxu0 %v2279_v3  ;;  %970 = vmatpush2.msra.mxu1 %v917_v61 }
  0x40   :  { %971 = vmatprep.subr.mxu1 %v2279_v3  ;;  %2045 = vmatmul.mubr.msk.f32.gmra.mxu1 %vm120_vm0, %v87_v62 }
  0x41   :  { %972 = vmatpush2.msra.mxu1 %v916_v63  ;;  %737 = vmatprep.mubr.f32.mxu1 %v2279_v3 }
  0x42   :  { %1998 = vmatmul.mubr.msk.f32.gmra.mxu0 %vm120_vm0, %v40_v60  ;;  %973 = vmatprep.subr.mxu1 %v2279_v3 }
  0x43   :  { %455 = vmatprep.mubr.f32.mxu0 %v2279_v3  ;;  %974 = vmatpush2.msra.mxu1 %v915_v1 }
  0x44   :  { %975 = vmatprep.subr.mxu1 %v2279_v3  ;;  %2046 = vmatmul.mubr.msk.f32.gmra.mxu1 %vm120_vm0, %v88_v2 }
  0x45   :  { %976 = vmatpush2.msra.mxu1 %v914_v4  ;;  %743 = vmatprep.mubr.f32.mxu1 %v2279_v3 }
  0x46   :  { %1999 = vmatmul.mubr.msk.f32.gmra.mxu0 %vm120_vm0, %v41_v0  ;;  %977 = vmatprep.subr.mxu1 %v2279_v3 }
  0x47   :  { %461 = vmatprep.mubr.f32.mxu0 %v2279_v3  ;;  %978 = vmatpush2.msra.mxu1 %v913_v6 }
  0x48   :  { %979 = vmatprep.subr.mxu1 %v2279_v3  ;;  %2047 = vmatmul.mubr.msk.f32.gmra.mxu1 %vm120_vm0, %v89_v7 }
  0x49   :  { %980 = vmatpush2.msra.mxu1 %v912_v8  ;;  %749 = vmatprep.mubr.f32.mxu1 %v2279_v3 }
  0x4a   :  { %2000 = vmatmul.mubr.msk.f32.gmra.mxu0 %vm120_vm0, %v42_v5  ;;  %981 = vmatprep.subr.mxu1 %v2279_v3 }
  0x4b   :  { %467 = vmatprep.mubr.f32.mxu0 %v2279_v3  ;;  %982 = vmatpush2.msra.mxu1 %v911_v10 }
  0x4c   :  { %983 = vmatprep.subr.mxu1 %v2279_v3  ;;  %2048 = vmatmul.mubr.msk.f32.gmra.mxu1 %vm120_vm0, %v90_v11 }
  0x4d   :  { %984 = vmatpush2.msra.mxu1 %v910_v12  ;;  %755 = vmatprep.mubr.f32.mxu1 %v2279_v3 }
  0x4e   :  { %2001 = vmatmul.mubr.msk.f32.gmra.mxu0 %vm120_vm0, %v43_v9  ;;  %985 = vmatprep.subr.mxu1 %v2279_v3 }
  0x4f   :  { %473 = vmatprep.mubr.f32.mxu0 %v2279_v3  ;;  %986 = vmatpush2.msra.mxu1 %v909_v14  ;;  %v1329_v14 = vld [vmem:[%s3886_s5 + $0x78] sm:$0xff] }
  0x50   :  { %987 = vmatprep.subr.mxu1 %v2279_v3  ;;  %2049 = vmatmul.mubr.msk.f32.gmra.mxu1 %vm120_vm0, %v91_v16 }
  0x51   :  { %988 = vmatpush2.msra.mxu1 %v908_v17  ;;  %2132 = vmatprep.subr.mxu0 %v1329_v14 }
  0x52   :  { %2002 = vmatmul.mubr.msk.f32.gmra.mxu0 %vm120_vm0, %v44_v13  ;;  %989 = vmatprep.subr.mxu1 %v2279_v3 }
  0x53   :  { %479 = vmatprep.mubr.f32.mxu0 %v2279_v3  ;;  %990 = vmatpush2.msra.mxu1 %v907_v18 }
  0x54   :  { %991 = vmatprep.subr.mxu1 %v2279_v3  ;;  %2133 = vmatpush3.msra.mxu0 %v1329_v14 }
  0x55   :  { %992 = vmatpush2.msra.mxu1 %v906_v20 }
  0x56   :  { %2003 = vmatmul.mubr.msk.f32.gmra.mxu0 %vm120_vm0, %v45_v15 }
  0x57   :  { %485 = vmatprep.mubr.f32.mxu0 %v2279_v3 }
  0x5a   :  { %2004 = vmatmul.mubr.msk.f32.gmra.mxu0 %vm120_vm0, %v46_v19 }
  0x5b   :  { %491 = vmatprep.mubr.f32.mxu0 %v2279_v3 }
  0x5e   :  { %2005 = vmatmul.mubr.msk.f32.gmra.mxu0 %vm120_vm0, %v47_v21 }
  0x5f   :  { %497 = vmatprep.mubr.f32.mxu0 %v2279_v3 }
  0x62   :  { %2006 = vmatmul.mubr.msk.f32.gmra.mxu0 %vm120_vm0, %v48_v22 }
  0x63   :  { %503 = vmatprep.mubr.f32.mxu0 %v2279_v3 }
  0x66   :  { %2007 = vmatmul.mubr.msk.f32.gmra.mxu0 %vm120_vm0, %v49_v23 }
  0x67   :  { %509 = vmatprep.mubr.f32.mxu0 %v2279_v3 }
  0x6a   :  { %2008 = vmatmul.mubr.msk.f32.gmra.mxu0 %vm120_vm0, %v50_v24 }
  0x6b   :  { %515 = vmatprep.mubr.f32.mxu0 %v2279_v3 }
  0x6e   :  { %2009 = vmatmul.mubr.msk.f32.gmra.mxu0 %vm120_vm0, %v51_v25 }
  0x6f   :  { %521 = vmatprep.mubr.f32.mxu0 %v2279_v3 }
  0x72   :  { %2010 = vmatmul.mubr.msk.f32.gmra.mxu0 %vm120_vm0, %v52_v26 }
  0x73   :  { %527 = vmatprep.mubr.f32.mxu0 %v2279_v3 }
  0x76   :  { %2011 = vmatmul.mubr.msk.f32.gmra.mxu0 %vm120_vm0, %v53_v27 }
  0x77   :  { %533 = vmatprep.mubr.f32.mxu0 %v2279_v3 }
  0x7a   :  { %2012 = vmatmul.mubr.msk.f32.gmra.mxu0 %vm120_vm0, %v54_v28 }
  0x7b   :  { %539 = vmatprep.mubr.f32.mxu0 %v2279_v3 }
  0x7e   :  { %2013 = vmatmul.mubr.msk.f32.gmra.mxu0 %vm120_vm0, %v55_v29 }
  0x7f   :  { %545 = vmatprep.mubr.f32.mxu0 %v2279_v3 }
  0x82   :  { %2014 = vmatmul.mubr.msk.f32.gmra.mxu0 %vm120_vm0, %v56_v30  ;;  %v1328_v30 = vld [vmem:[%s3886_s5 + $0x70] sm:$0xff] }
  0x83   :  { %551 = vmatprep.mubr.f32.mxu0 %v2279_v3  ;;  %2134 = vmatprep.subr.mxu0 %v1328_v30 }
  0x84   :  { %2135 = vmatpush3.msra.mxu0 %v1328_v30 }
  0x86   :  { %2015 = vmatmul.mubr.msk.f32.gmra.mxu0 %vm120_vm0, %v57_v31 }
  0x87   :  { %557 = vmatprep.mubr.f32.mxu0 %v2279_v3 }
  0x8a   :  { %2016 = vmatmul.mubr.msk.f32.gmra.mxu0 %vm120_vm0, %v58_v32 }
  0x8b   :  { %563 = vmatprep.mubr.f32.mxu0 %v2279_v3 }
  0x8e   :  { %2017 = vmatmul.mubr.msk.f32.gmra.mxu0 %vm120_vm0, %v59_v33 }
  0x8f   :  { %569 = vmatprep.mubr.f32.mxu0 %v2279_v3 }
  0x92   :  { %2018 = vmatmul.mubr.msk.f32.gmra.mxu0 %vm120_vm0, %v60_v34 }
  0x93   :  { %575 = vmatprep.mubr.f32.mxu0 %v2279_v3 }
  0x96   :  { %2019 = vmatmul.mubr.msk.f32.gmra.mxu0 %vm120_vm0, %v61_v35 }
  0x97   :  { %581 = vmatprep.mubr.f32.mxu0 %v2279_v3 }
  0x9a   :  { %2020 = vmatmul.mubr.msk.f32.gmra.mxu0 %vm120_vm0, %v62_v36 }
  0x9b   :  { %587 = vmatprep.mubr.f32.mxu0 %v2279_v3 }
  0x9e   :  { %2021 = vmatmul.mubr.msk.f32.gmra.mxu0 %vm120_vm0, %v63_v37 }
  0x9f   :  { %593 = vmatprep.mubr.f32.mxu0 %v2279_v3 }
  0xa2   :  { %2022 = vmatmul.mubr.msk.f32.gmra.mxu0 %vm120_vm0, %v64_v38 }
  0xa3   :  { %599 = vmatprep.mubr.f32.mxu0 %v2279_v3 }
  0xa6   :  { %2023 = vmatmul.mubr.msk.f32.gmra.mxu0 %vm120_vm0, %v65_v39 }
  0xa7   :  { %605 = vmatprep.mubr.f32.mxu0 %v2279_v3 }
  0xaa   :  { %2024 = vmatmul.mubr.msk.f32.gmra.mxu0 %vm120_vm0, %v66_v40 }
  0xab   :  { %611 = vmatprep.mubr.f32.mxu0 %v2279_v3 }
  0xae   :  { %2025 = vmatmul.mubr.msk.f32.gmra.mxu0 %vm120_vm0, %v67_v41 }
  0xaf   :  { %617 = vmatprep.mubr.f32.mxu0 %v2279_v3 }
  0xb2   :  { %2026 = vmatmul.mubr.msk.f32.gmra.mxu0 %vm120_vm0, %v68_v42 }
  0xb3   :  { %623 = vmatprep.mubr.f32.mxu0 %v2279_v3 }
  0xb6   :  { %2027 = vmatmul.mubr.msk.f32.gmra.mxu0 %vm120_vm0, %v69_v43 }
  0xb7   :  { %629 = vmatprep.mubr.f32.mxu0 %v2279_v3 }
  0xba   :  { %2028 = vmatmul.mubr.msk.f32.gmra.mxu0 %vm120_vm0, %v70_v44 }
  0xbb   :  { %635 = vmatprep.mubr.f32.mxu0 %v2279_v3 }
  0xbe   :  { %2029 = vmatmul.mubr.msk.f32.gmra.mxu0 %vm120_vm0, %v71_v45 }
  0xbf   :  { %641 = vmatprep.mubr.f32.mxu0 %v2279_v3 }
  0xc2   :  { %2030 = vmatmul.mubr.msk.f32.gmra.mxu0 %vm120_vm0, %v72_v46 }
  0xc3   :  { %647 = vmatprep.mubr.f32.mxu0 %v2279_v3 }
  0xc6   :  { %2031 = vmatmul.mubr.msk.f32.gmra.mxu0 %vm120_vm0, %v73_v47 }
  0xc7   :  { %653 = vmatprep.mubr.f32.mxu0 %v2279_v3 }
  0xca   :  { %2032 = vmatmul.mubr.msk.f32.gmra.mxu0 %vm120_vm0, %v74_v49  ;;  %v1327_v49 = vld [vmem:[%s3886_s5 + $0x68] sm:$0xff] }
  0xcb   :  { %659 = vmatprep.mubr.f32.mxu0 %v2279_v3  ;;  %2136 = vmatprep.subr.mxu0 %v1327_v49 }
  0xcc   :  { %2137 = vmatpush3.msra.mxu0 %v1327_v49 }
  0xce   :  { %2033 = vmatmul.mubr.msk.f32.gmra.mxu0 %vm120_vm0, %v75_v51 }
  0xd2   :  { %v379_v57 = vpop.f32.mrf.mxu0 }
  0xd3   :  { %v380_v58 = vadd.f32 %v379_v57, %v2824_v55 }
  0xd4   :  { %v381_v3 = vpop.f32.mrf.mxu0 }
  0xd5   :  { %v382_v59 = vadd.f32 %v381_v3, %v2826_v56  ;;  %v762_v62 = vmax.f32 %v380_v58, 0.0 }
  0xd6   :  { %v385_v60 = vpop.f32.mrf.mxu0 }
  0xd7   :  { %v763_v61 = vmax.f32 %v382_v59, 0.0  ;;  %v386_v63 = vadd.f32 %v385_v60, %v2824_v55 }
  0xd8   :  { %v387_v0 = vpop.f32.mrf.mxu0 }
  0xd9   :  { %v388_v1 = vadd.f32 %v387_v0, %v2826_v56  ;;  %993 = vmatprep.mubr.f32.mxu1 %v763_v61  ;;  %v764_v5 = vmax.f32 %v386_v63, 0.0 }
  0xda   :  { %v391_v2 = vpop.f32.mrf.mxu0  ;;  %994 = vmatmul.mubr.f32.vlgmr.msra.gmra.mxu1 %v762_v62 }
  0xdb   :  { %v765_v4 = vmax.f32 %v388_v1, 0.0  ;;  %v392_v6 = vadd.f32 %v391_v2, %v2824_v55 }
  0xdc   :  { %v393_v7 = vpop.f32.mrf.mxu0 }
  0xdd   :  { %v394_v8 = vadd.f32 %v393_v7, %v2826_v56  ;;  %998 = vmatprep.mubr.f32.mxu1 %v765_v4  ;;  %v766_v11 = vmax.f32 %v392_v6, 0.0  ;;  %v1326_v6 = vld [vmem:[%s3886_s5 + $0x60] sm:$0xff] }
  0xde   :  { %v397_v9 = vpop.f32.mrf.mxu0  ;;  %999 = vmatmul.mubr.f32.gmra.mxu1 %v764_v5  ;;  %2138 = vmatprep.subr.mxu0 %v1326_v6 }
  0xdf   :  { %v767_v10 = vmax.f32 %v394_v8, 0.0  ;;  %v398_v12 = vadd.f32 %v397_v9, %v2824_v55  ;;  %2139 = vmatpush3.msra.mxu0 %v1326_v6 }
  0xe0   :  { %v399_v13 = vpop.f32.mrf.mxu0 }
  0xe1   :  { %v400_v15 = vadd.f32 %v399_v13, %v2826_v56  ;;  %1003 = vmatprep.mubr.f32.mxu1 %v767_v10  ;;  %v768_v18 = vmax.f32 %v398_v12, 0.0 }
  0xe2   :  { %v403_v16 = vpop.f32.mrf.mxu0  ;;  %1004 = vmatmul.mubr.f32.gmra.mxu1 %v766_v11 }
  0xe3   :  { %v769_v17 = vmax.f32 %v400_v15, 0.0  ;;  %v404_v19 = vadd.f32 %v403_v16, %v2824_v55  ;;  %v1325_v16 = vld [vmem:[%s3886_s5 + $0x58] sm:$0xff] }
  0xe4   :  { %v405_v20 = vpop.f32.mrf.mxu0  ;;  %2140 = vmatprep.subr.mxu0 %v1325_v16 }
  0xe5   :  { %v406_v21 = vadd.f32 %v405_v20, %v2826_v56  ;;  %1008 = vmatprep.mubr.f32.mxu1 %v769_v17  ;;  %v770_v24 = vmax.f32 %v404_v19, 0.0  ;;  %2141 = vmatpush3.msra.mxu0 %v1325_v16  ;;  %v1324_v19 = vld [vmem:[%s3886_s5 + $0x50] sm:$0xff] }
  0xe6   :  { %v409_v22 = vpop.f32.mrf.mxu0  ;;  %1009 = vmatmul.mubr.f32.gmra.mxu1 %v768_v18  ;;  %2142 = vmatprep.subr.mxu0 %v1324_v19 }
  0xe7   :  { %v771_v23 = vmax.f32 %v406_v21, 0.0  ;;  %v410_v25 = vadd.f32 %v409_v22, %v2824_v55  ;;  %2143 = vmatpush3.msra.mxu0 %v1324_v19 }
  0xe8   :  { %v411_v26 = vpop.f32.mrf.mxu0 }
  0xe9   :  { %v412_v27 = vadd.f32 %v411_v26, %v2826_v56  ;;  %1013 = vmatprep.mubr.f32.mxu1 %v771_v23  ;;  %v772_v31 = vmax.f32 %v410_v25, 0.0 }
  0xea   :  { %v415_v28 = vpop.f32.mrf.mxu0  ;;  %1014 = vmatmul.mubr.f32.gmra.mxu1 %v770_v24  ;;  %v1323_v24 = vld [vmem:[%s3886_s5 + $0x48] sm:$0xff] }
  0xeb   :  { %v773_v29 = vmax.f32 %v412_v27, 0.0  ;;  %v416_v32 = vadd.f32 %v415_v28, %v2824_v55  ;;  %2144 = vmatprep.subr.mxu0 %v1323_v24  ;;  %v1322_v27 = vld [vmem:[%s3886_s5 + $0x40] sm:$0xff] }
  0xec   :  { %v417_v33 = vpop.f32.mrf.mxu0  ;;  %2145 = vmatpush3.msra.mxu0 %v1323_v24 }
  0xed   :  { %v418_v34 = vadd.f32 %v417_v33, %v2826_v56  ;;  %1018 = vmatprep.mubr.f32.mxu1 %v773_v29  ;;  %v774_v37 = vmax.f32 %v416_v32, 0.0  ;;  %2146 = vmatprep.subr.mxu0 %v1322_v27  ;;  %v1321_v32 = vld [vmem:[%s3886_s5 + $0x38] sm:$0xff] }
  0xee   :  { %v421_v35 = vpop.f32.mrf.mxu0  ;;  %1019 = vmatmul.mubr.f32.gmra.mxu1 %v772_v31  ;;  %2147 = vmatpush3.msra.mxu0 %v1322_v27 }
  0xef   :  { %v775_v36 = vmax.f32 %v418_v34, 0.0  ;;  %v422_v38 = vadd.f32 %v421_v35, %v2824_v55  ;;  %2148 = vmatprep.subr.mxu0 %v1321_v32  ;;  %v1320_v35 = vld [vmem:[%s3886_s5 + $0x30] sm:$0xff] }
  0xf0   :  { %v423_v39 = vpop.f32.mrf.mxu0  ;;  %2149 = vmatpush3.msra.mxu0 %v1321_v32 }
  0xf1   :  { %v424_v40 = vadd.f32 %v423_v39, %v2826_v56  ;;  %1023 = vmatprep.mubr.f32.mxu1 %v775_v36  ;;  %v776_v43 = vmax.f32 %v422_v38, 0.0  ;;  %2150 = vmatprep.subr.mxu0 %v1320_v35 }
  0xf2   :  { %v427_v41 = vpop.f32.mrf.mxu0  ;;  %1024 = vmatmul.mubr.f32.gmra.mxu1 %v774_v37  ;;  %2151 = vmatpush3.msra.mxu0 %v1320_v35 }
  0xf3   :  { %v777_v42 = vmax.f32 %v424_v40, 0.0  ;;  %v428_v44 = vadd.f32 %v427_v41, %v2824_v55  ;;  %v1319_v40 = vld [vmem:[%s3886_s5 + $0x28] sm:$0xff] }
  0xf4   :  { %v429_v45 = vpop.f32.mrf.mxu0  ;;  %2152 = vmatprep.subr.mxu0 %v1319_v40 }
  0xf5   :  { %v430_v46 = vadd.f32 %v429_v45, %v2826_v56  ;;  %1028 = vmatprep.mubr.f32.mxu1 %v777_v42  ;;  %v778_v50 = vmax.f32 %v428_v44, 0.0  ;;  %2153 = vmatpush3.msra.mxu0 %v1319_v40  ;;  %v1317_v45 = vld [vmem:[%s3886_s5 + $0x18] sm:$0xff] }
  0xf6   :  { %v433_v47 = vpop.f32.mrf.mxu0  ;;  %1029 = vmatmul.mubr.f32.gmra.mxu1 %v776_v43  ;;  %v1318_v43 = vld [vmem:[%s3886_s5 + $0x20] sm:$0xff] }
  0xf7   :  { %v779_v48 = vmax.f32 %v430_v46, 0.0  ;;  %v434_v51 = vadd.f32 %v433_v47, %v2824_v55  ;;  %2154 = vmatprep.subr.mxu0 %v1318_v43 }
  0xf8   :  { %v435_v52 = vpop.f32.mrf.mxu0  ;;  %2155 = vmatpush3.msra.mxu0 %v1318_v43 }
  0xf9   :  { %v436_v53 = vadd.f32 %v435_v52, %v2826_v56  ;;  %1033 = vmatprep.mubr.f32.mxu1 %v779_v48  ;;  %v780_v58 = vmax.f32 %v434_v51, 0.0  ;;  %2156 = vmatprep.subr.mxu0 %v1317_v45  ;;  %v1316_v51 = vld [vmem:[%s3886_s5 + $0x10] sm:$0xff] }
  0xfa   :  { %v439_v54 = vpop.f32.mrf.mxu0  ;;  %1034 = vmatmul.mubr.f32.gmra.mxu1 %v778_v50  ;;  %2157 = vmatpush3.msra.mxu0 %v1317_v45 }
  0xfb   :  { %v781_v57 = vmax.f32 %v436_v53, 0.0  ;;  %v440_v3 = vadd.f32 %v439_v54, %v2824_v55  ;;  %2158 = vmatprep.subr.mxu0 %v1316_v51 }
  0xfc   :  { %v441_v59 = vpop.f32.mrf.mxu0  ;;  %2159 = vmatpush3.msra.mxu0 %v1316_v51 }
  0xfd   :  { %v442_v60 = vadd.f32 %v441_v59, %v2826_v56  ;;  %1038 = vmatprep.mubr.f32.mxu1 %v781_v57  ;;  %v782_v63 = vmax.f32 %v440_v3, 0.0  ;;  %v1315_v3 = vld [vmem:[%s3886_s5 + $0x8] sm:$0xff] }
  0xfe   :  { %v445_v61 = vpop.f32.mrf.mxu0  ;;  %1039 = vmatmul.mubr.f32.gmra.mxu1 %v780_v58  ;;  %v2907_v58 = vpop.f32.mrf.mxu1  ;;  %2160 = vmatprep.subr.mxu0 %v1315_v3 }
  0xff   :  { %v783_v62 = vmax.f32 %v442_v60, 0.0  ;;  %v446_v0 = vadd.f32 %v445_v61, %v2824_v55  ;;  %2161 = vmatpush3.msra.mxu0 %v1315_v3  ;;  %v1314_v61 = vld [vmem:[%s3886_s5] sm:$0xff] }
 0x100   :  { %v447_v1 = vpop.f32.mrf.mxu0  ;;  %2162 = vmatprep.subr.mxu0 %v1314_v61 }
 0x101   :  { %v448_v2 = vadd.f32 %v447_v1, %v2826_v56  ;;  %1043 = vmatprep.mubr.f32.mxu1 %v783_v62  ;;  %v784_v7 = vmax.f32 %v446_v0, 0.0  ;;  %2163 = vmatpush3.msra.mxu0 %v1314_v61 }
 0x102   :  { %v451_v4 = vpop.f32.mrf.mxu0  ;;  %1044 = vmatmul.mubr.f32.gmra.mxu1 %v782_v63 }
 0x103   :  { %v785_v5 = vmax.f32 %v448_v2, 0.0  ;;  %v452_v8 = vadd.f32 %v451_v4, %v2824_v55  ;;  %v2917_v2 = vpop.f32.mrf.mxu1 }
 0x104   :  { %v453_v9 = vpop.f32.mrf.mxu0 }
 0x105   :  { %v454_v10 = vadd.f32 %v453_v9, %v2826_v56  ;;  %1048 = vmatprep.mubr.f32.mxu1 %v785_v5  ;;  %v786_v13 = vmax.f32 %v452_v8, 0.0 }
 0x106   :  { %v457_v11 = vpop.f32.mrf.mxu0  ;;  %1049 = vmatmul.mubr.f32.gmra.mxu1 %v784_v7 }
 0x107   :  { %v787_v12 = vmax.f32 %v454_v10, 0.0  ;;  %v458_v14 = vadd.f32 %v457_v11, %v2824_v55  ;;  %v2921_v10 = vpop.f32.mrf.mxu1 }
 0x108   :  { %v459_v15 = vpop.f32.mrf.mxu0 }
 0x109   :  { %v460_v17 = vadd.f32 %v459_v15, %v2826_v56  ;;  %1053 = vmatprep.mubr.f32.mxu1 %v787_v12  ;;  %v788_v21 = vmax.f32 %v458_v14, 0.0 }
 0x10a   :  { %v463_v18 = vpop.f32.mrf.mxu0  ;;  %1054 = vmatmul.mubr.f32.gmra.mxu1 %v786_v13 }
 0x10b   :  { %v789_v20 = vmax.f32 %v460_v17, 0.0  ;;  %v464_v22 = vadd.f32 %v463_v18, %v2824_v55  ;;  %v2925_v17 = vpop.f32.mrf.mxu1 }
 0x10c   :  { %v465_v23 = vpop.f32.mrf.mxu0 }
 0x10d   :  { %v466_v25 = vadd.f32 %v465_v23, %v2826_v56  ;;  %1058 = vmatprep.mubr.f32.mxu1 %v789_v20  ;;  %v790_v29 = vmax.f32 %v464_v22, 0.0  ;;  %v2929_v24 = vpop.f32.mrf.mxu1 }
 0x10e   :  { %v469_v26 = vpop.f32.mrf.mxu0  ;;  %1059 = vmatmul.mubr.f32.gmra.mxu1 %v788_v21 }
 0x10f   :  { %v791_v28 = vmax.f32 %v466_v25, 0.0  ;;  %v470_v30 = vadd.f32 %v469_v26, %v2824_v55 }
 0x110   :  { %v471_v31 = vpop.f32.mrf.mxu0 }
 0x111   :  { %v472_v33 = vadd.f32 %v471_v31, %v2826_v56  ;;  %1063 = vmatprep.mubr.f32.mxu1 %v791_v28  ;;  %v792_v37 = vmax.f32 %v470_v30, 0.0  ;;  %v2933_v31 = vpop.f32.mrf.mxu1 }
 0x112   :  { %v475_v34 = vpop.f32.mrf.mxu0  ;;  %1064 = vmatmul.mubr.f32.gmra.mxu1 %v790_v29 }
 0x113   :  { %v793_v36 = vmax.f32 %v472_v33, 0.0  ;;  %v476_v38 = vadd.f32 %v475_v34, %v2824_v55 }
 0x114   :  { %v477_v39 = vpop.f32.mrf.mxu0 }
 0x115   :  { %v478_v41 = vadd.f32 %v477_v39, %v2826_v56  ;;  %1068 = vmatprep.mubr.f32.mxu1 %v793_v36  ;;  %v794_v46 = vmax.f32 %v476_v38, 0.0  ;;  %v2937_v38 = vpop.f32.mrf.mxu1 }
 0x116   :  { %v481_v42 = vpop.f32.mrf.mxu0  ;;  %1069 = vmatmul.mubr.f32.gmra.mxu1 %v792_v37 }
 0x117   :  { %v795_v44 = vmax.f32 %v478_v41, 0.0  ;;  %v482_v47 = vadd.f32 %v481_v42, %v2824_v55  ;;  %v2941_v45 = vpop.f32.mrf.mxu1 }
 0x118   :  { %v483_v48 = vpop.f32.mrf.mxu0 }
 0x119   :  { %v484_v49 = vadd.f32 %v483_v48, %v2826_v56  ;;  %1073 = vmatprep.mubr.f32.mxu1 %v795_v44  ;;  %v796_v53 = vmax.f32 %v482_v47, 0.0 }
 0x11a   :  { %v487_v50 = vpop.f32.mrf.mxu0  ;;  %1074 = vmatmul.mubr.f32.gmra.mxu1 %v794_v46 }
 0x11b   :  { %v797_v52 = vmax.f32 %v484_v49, 0.0  ;;  %v488_v54 = vadd.f32 %v487_v50, %v2824_v55 }
 0x11c   :  { %v489_v57 = vpop.f32.mrf.mxu0 }
 0x11d   :  { %v490_v59 = vadd.f32 %v489_v57, %v2826_v56  ;;  %1078 = vmatprep.mubr.f32.mxu1 %v797_v52  ;;  %v798_v63 = vmax.f32 %v488_v54, 0.0  ;;  %v2945_v52 = vpop.f32.mrf.mxu1 }
 0x11e   :  { %v493_v60 = vpop.f32.mrf.mxu0  ;;  %1079 = vmatmul.mubr.f32.gmra.mxu1 %v796_v53 }
 0x11f   :  { %v799_v62 = vmax.f32 %v490_v59, 0.0  ;;  %v494_v0 = vadd.f32 %v493_v60, %v2824_v55  ;;  %v2949_v61 = vpop.f32.mrf.mxu1 }
 0x120   :  { %v495_v1 = vpop.f32.mrf.mxu0 }
 0x121   :  { %v496_v4 = vadd.f32 %v495_v1, %v2826_v56  ;;  %1083 = vmatprep.mubr.f32.mxu1 %v799_v62  ;;  %v800_v7 = vmax.f32 %v494_v0, 0.0 }
 0x122   :  { %v499_v5 = vpop.f32.mrf.mxu0  ;;  %1084 = vmatmul.mubr.f32.gmra.mxu1 %v798_v63 }
 0x123   :  { %v801_v6 = vmax.f32 %v496_v4, 0.0  ;;  %v500_v8 = vadd.f32 %v499_v5, %v2824_v55 }
 0x124   :  { %v501_v9 = vpop.f32.mrf.mxu0 }
 0x125   :  { %v502_v11 = vadd.f32 %v501_v9, %v2826_v56  ;;  %1088 = vmatprep.mubr.f32.mxu1 %v801_v6  ;;  %v802_v14 = vmax.f32 %v500_v8, 0.0  ;;  %v2953_v6 = vpop.f32.mrf.mxu1 }
 0x126   :  { %v505_v12 = vpop.f32.mrf.mxu0  ;;  %1089 = vmatmul.mubr.f32.gmra.mxu1 %v800_v7 }
 0x127   :  { %v803_v13 = vmax.f32 %v502_v11, 0.0  ;;  %v506_v15 = vadd.f32 %v505_v12, %v2824_v55 }
 0x128   :  { %v507_v16 = vpop.f32.mrf.mxu0 }
 0x129   :  { %v508_v18 = vadd.f32 %v507_v16, %v2826_v56  ;;  %1093 = vmatprep.mubr.f32.mxu1 %v803_v13  ;;  %v804_v21 = vmax.f32 %v506_v15, 0.0 }
 0x12a   :  { %v511_v19 = vpop.f32.mrf.mxu0  ;;  %1094 = vmatmul.mubr.f32.gmra.mxu1 %v802_v14  ;;  %v2957_v14 = vpop.f32.mrf.mxu1 }
 0x12b   :  { %v805_v20 = vmax.f32 %v508_v18, 0.0  ;;  %v512_v22 = vadd.f32 %v511_v19, %v2824_v55 }
 0x12c   :  { %v513_v23 = vpop.f32.mrf.mxu0 }
 0x12d   :  { %v514_v25 = vadd.f32 %v513_v23, %v2826_v56  ;;  %1098 = vmatprep.mubr.f32.mxu1 %v805_v20  ;;  %v806_v28 = vmax.f32 %v512_v22, 0.0  ;;  %v2961_v22 = vpop.f32.mrf.mxu1 }
 0x12e   :  { %v517_v26 = vpop.f32.mrf.mxu0  ;;  %1099 = vmatmul.mubr.f32.gmra.mxu1 %v804_v21 }
 0x12f   :  { %v807_v27 = vmax.f32 %v514_v25, 0.0  ;;  %v518_v29 = vadd.f32 %v517_v26, %v2824_v55 }
 0x130   :  { %v519_v30 = vpop.f32.mrf.mxu0 }
 0x131   :  { %v520_v32 = vadd.f32 %v519_v30, %v2826_v56  ;;  %1103 = vmatprep.mubr.f32.mxu1 %v807_v27  ;;  %v808_v35 = vmax.f32 %v518_v29, 0.0  ;;  %v2965_v30 = vpop.f32.mrf.mxu1 }
 0x132   :  { %v523_v33 = vpop.f32.mrf.mxu0  ;;  %1104 = vmatmul.mubr.f32.gmra.mxu1 %v806_v28 }
 0x133   :  { %v809_v34 = vmax.f32 %v520_v32, 0.0  ;;  %v524_v36 = vadd.f32 %v523_v33, %v2824_v55 }
 0x134   :  { %v525_v37 = vpop.f32.mrf.mxu0 }
 0x135   :  { %v526_v39 = vadd.f32 %v525_v37, %v2826_v56  ;;  %1108 = vmatprep.mubr.f32.mxu1 %v809_v34  ;;  %v810_v42 = vmax.f32 %v524_v36, 0.0 }
 0x136   :  { %v529_v40 = vpop.f32.mrf.mxu0  ;;  %1109 = vmatmul.mubr.f32.gmra.mxu1 %v808_v35 }
 0x137   :  { %v811_v41 = vmax.f32 %v526_v39, 0.0  ;;  %v530_v43 = vadd.f32 %v529_v40, %v2824_v55  ;;  %v2969_v39 = vpop.f32.mrf.mxu1 }
 0x138   :  { %v531_v44 = vpop.f32.mrf.mxu0 }
 0x139   :  { %v532_v46 = vadd.f32 %v531_v44, %v2826_v56  ;;  %1113 = vmatprep.mubr.f32.mxu1 %v811_v41  ;;  %v812_v49 = vmax.f32 %v530_v43, 0.0 }
 0x13a   :  { %v535_v47 = vpop.f32.mrf.mxu0  ;;  %1114 = vmatmul.mubr.f32.gmra.mxu1 %v810_v42 }
 0x13b   :  { %v813_v48 = vmax.f32 %v532_v46, 0.0  ;;  %v536_v50 = vadd.f32 %v535_v47, %v2824_v55  ;;  %v2973_v47 = vpop.f32.mrf.mxu1 }
 0x13c   :  { %v537_v51 = vpop.f32.mrf.mxu0 }
 0x13d   :  { %v538_v53 = vadd.f32 %v537_v51, %v2826_v56  ;;  %1118 = vmatprep.mubr.f32.mxu1 %v813_v48  ;;  %v814_v3 = vmax.f32 %v536_v50, 0.0 }
 0x13e   :  { %v541_v54 = vpop.f32.mrf.mxu0  ;;  %1119 = vmatmul.mubr.f32.gmra.mxu1 %v812_v49 }
 0x13f   :  { %v815_v57 = vmax.f32 %v538_v53, 0.0  ;;  %v542_v59 = vadd.f32 %v541_v54, %v2824_v55 }
 0x140   :  { %v543_v60 = vpop.f32.mrf.mxu0 }
 0x141   :  { %v544_v62 = vadd.f32 %v543_v60, %v2826_v56  ;;  %1123 = vmatprep.mubr.f32.mxu1 %v815_v57  ;;  %v816_v1 = vmax.f32 %v542_v59, 0.0  ;;  %v2977_v57 = vpop.f32.mrf.mxu1 }
 0x142   :  { %v547_v63 = vpop.f32.mrf.mxu0  ;;  %1124 = vmatmul.mubr.f32.gmra.mxu1 %v814_v3 }
 0x143   :  { %v817_v0 = vmax.f32 %v544_v62, 0.0  ;;  %v548_v4 = vadd.f32 %v547_v63, %v2824_v55 }
 0x144   :  { %v549_v5 = vpop.f32.mrf.mxu0 }
 0x145   :  { %v550_v7 = vadd.f32 %v549_v5, %v2826_v56  ;;  %1128 = vmatprep.mubr.f32.mxu1 %v817_v0  ;;  %v818_v11 = vmax.f32 %v548_v4, 0.0 }
 0x146   :  { %v553_v8 = vpop.f32.mrf.mxu0  ;;  %1129 = vmatmul.mubr.f32.gmra.mxu1 %v816_v1  ;;  %v2981_v1 = vpop.f32.mrf.mxu1 }
 0x147   :  { %v819_v9 = vmax.f32 %v550_v7, 0.0  ;;  %v554_v12 = vadd.f32 %v553_v8, %v2824_v55 }
 0x148   :  { %v555_v13 = vpop.f32.mrf.mxu0 }
 0x149   :  { %v556_v15 = vadd.f32 %v555_v13, %v2826_v56  ;;  %1133 = vmatprep.mubr.f32.mxu1 %v819_v9  ;;  %v820_v19 = vmax.f32 %v554_v12, 0.0  ;;  %v2985_v12 = vpop.f32.mrf.mxu1 }
 0x14a   :  { %v559_v16 = vpop.f32.mrf.mxu0  ;;  %1134 = vmatmul.mubr.f32.gmra.mxu1 %v818_v11 }
 0x14b   :  { %v821_v18 = vmax.f32 %v556_v15, 0.0  ;;  %v560_v20 = vadd.f32 %v559_v16, %v2824_v55 }
 0x14c   :  { %v561_v21 = vpop.f32.mrf.mxu0 }
 0x14d   :  { %v562_v23 = vadd.f32 %v561_v21, %v2826_v56  ;;  %1138 = vmatprep.mubr.f32.mxu1 %v821_v18  ;;  %v822_v27 = vmax.f32 %v560_v20, 0.0  ;;  %v2989_v21 = vpop.f32.mrf.mxu1 }
 0x14e   :  { %v565_v25 = vpop.f32.mrf.mxu0  ;;  %1139 = vmatmul.mubr.f32.gmra.mxu1 %v820_v19 }
 0x14f   :  { %v823_v26 = vmax.f32 %v562_v23, 0.0  ;;  %v566_v28 = vadd.f32 %v565_v25, %v2824_v55 }
 0x150   :  { %v567_v29 = vpop.f32.mrf.mxu0 }
 0x151   :  { %v568_v32 = vadd.f32 %v567_v29, %v2826_v56  ;;  %1143 = vmatprep.mubr.f32.mxu1 %v823_v26  ;;  %v824_v35 = vmax.f32 %v566_v28, 0.0 }
 0x152   :  { %v571_v33 = vpop.f32.mrf.mxu0  ;;  %1144 = vmatmul.mubr.f32.gmra.mxu1 %v822_v27 }
 0x153   :  { %v825_v34 = vmax.f32 %v568_v32, 0.0  ;;  %v572_v36 = vadd.f32 %v571_v33, %v2824_v55  ;;  %v2993_v32 = vpop.f32.mrf.mxu1 }
 0x154   :  { %v573_v37 = vpop.f32.mrf.mxu0 }
 0x155   :  { %v574_v40 = vadd.f32 %v573_v37, %v2826_v56  ;;  %1148 = vmatprep.mubr.f32.mxu1 %v825_v34  ;;  %v826_v43 = vmax.f32 %v572_v36, 0.0 }
 0x156   :  { %v577_v41 = vpop.f32.mrf.mxu0  ;;  %1149 = vmatmul.mubr.f32.gmra.mxu1 %v824_v35 }
 0x157   :  { %v827_v42 = vmax.f32 %v574_v40, 0.0  ;;  %v578_v44 = vadd.f32 %v577_v41, %v2824_v55  ;;  %v2997_v41 = vpop.f32.mrf.mxu1 }
 0x158   :  { %v579_v46 = vpop.f32.mrf.mxu0 }
 0x159   :  { %v580_v48 = vadd.f32 %v579_v46, %v2826_v56  ;;  %1153 = vmatprep.mubr.f32.mxu1 %v827_v42  ;;  %v828_v51 = vmax.f32 %v578_v44, 0.0 }
 0x15a   :  { %v583_v49 = vpop.f32.mrf.mxu0  ;;  %1154 = vmatmul.mubr.f32.gmra.mxu1 %v826_v43 }
 0x15b   :  { %v829_v50 = vmax.f32 %v580_v48, 0.0  ;;  %v584_v53 = vadd.f32 %v583_v49, %v2824_v55 }
 0x15c   :  { %v585_v54 = vpop.f32.mrf.mxu0 }
 0x15d   :  { %v586_v3 = vadd.f32 %v585_v54, %v2826_v56  ;;  %1158 = vmatprep.mubr.f32.mxu1 %v829_v50  ;;  %v830_v62 = vmax.f32 %v584_v53, 0.0  ;;  %v3001_v50 = vpop.f32.mrf.mxu1 }
 0x15e   :  { %v589_v59 = vpop.f32.mrf.mxu0  ;;  %1159 = vmatmul.mubr.f32.gmra.mxu1 %v828_v51 }
 0x15f   :  { %v831_v60 = vmax.f32 %v586_v3, 0.0  ;;  %v590_v63 = vadd.f32 %v589_v59, %v2824_v55 }
 0x160   :  { %v591_v0 = vpop.f32.mrf.mxu0 }
 0x161   :  { %v592_v4 = vadd.f32 %v591_v0, %v2826_v56  ;;  %1163 = vmatprep.mubr.f32.mxu1 %v831_v60  ;;  %v832_v8 = vmax.f32 %v590_v63, 0.0 }
 0x162   :  { %v595_v5 = vpop.f32.mrf.mxu0  ;;  %1164 = vmatmul.mubr.f32.gmra.mxu1 %v830_v62  ;;  %v3005_v62 = vpop.f32.mrf.mxu1 }
 0x163   :  { %v833_v7 = vmax.f32 %v592_v4, 0.0  ;;  %v596_v9 = vadd.f32 %v595_v5, %v2824_v55 }
 0x164   :  { %v597_v11 = vpop.f32.mrf.mxu0 }
 0x165   :  { %v598_v13 = vadd.f32 %v597_v11, %v2826_v56  ;;  %1168 = vmatprep.mubr.f32.mxu1 %v833_v7  ;;  %v834_v18 = vmax.f32 %v596_v9, 0.0  ;;  %v3009_v9 = vpop.f32.mrf.mxu1 }
 0x166   :  { %v601_v15 = vpop.f32.mrf.mxu0  ;;  %1169 = vmatmul.mubr.f32.gmra.mxu1 %v832_v8 }
 0x167   :  { %v835_v16 = vmax.f32 %v598_v13, 0.0  ;;  %v602_v19 = vadd.f32 %v601_v15, %v2824_v55 }
 0x168   :  { %v603_v20 = vpop.f32.mrf.mxu0 }
 0x169   :  { %v604_v23 = vadd.f32 %v603_v20, %v2826_v56  ;;  %1173 = vmatprep.mubr.f32.mxu1 %v835_v16  ;;  %v836_v27 = vmax.f32 %v602_v19, 0.0  ;;  %v3013_v20 = vpop.f32.mrf.mxu1 }
 0x16a   :  { %v607_v25 = vpop.f32.mrf.mxu0  ;;  %1174 = vmatmul.mubr.f32.gmra.mxu1 %v834_v18 }
 0x16b   :  { %v837_v26 = vmax.f32 %v604_v23, 0.0  ;;  %v608_v28 = vadd.f32 %v607_v25, %v2824_v55 }
 0x16c   :  { %v609_v29 = vpop.f32.mrf.mxu0 }
 0x16d   :  { %v610_v33 = vadd.f32 %v609_v29, %v2826_v56  ;;  %1178 = vmatprep.mubr.f32.mxu1 %v837_v26  ;;  %v838_v36 = vmax.f32 %v608_v28, 0.0 }
 0x16e   :  { %v613_v34 = vpop.f32.mrf.mxu0  ;;  %1179 = vmatmul.mubr.f32.gmra.mxu1 %v836_v27 }
 0x16f   :  { %v839_v35 = vmax.f32 %v610_v33, 0.0  ;;  %v614_v37 = vadd.f32 %v613_v34, %v2824_v55  ;;  %v3017_v33 = vpop.f32.mrf.mxu1 }
 0x170   :  { %v615_v40 = vpop.f32.mrf.mxu0 }
 0x171   :  { %v616_v42 = vadd.f32 %v615_v40, %v2826_v56  ;;  %1183 = vmatprep.mubr.f32.mxu1 %v839_v35  ;;  %v840_v46 = vmax.f32 %v614_v37, 0.0 }
 0x172   :  { %v619_v43 = vpop.f32.mrf.mxu0  ;;  %1184 = vmatmul.mubr.f32.gmra.mxu1 %v838_v36 }
 0x173   :  { %v841_v44 = vmax.f32 %v616_v42, 0.0  ;;  %v620_v48 = vadd.f32 %v619_v43, %v2824_v55  ;;  %v3021_v43 = vpop.f32.mrf.mxu1 }
 0x174   :  { %v621_v49 = vpop.f32.mrf.mxu0 }
 0x175   :  { %v622_v51 = vadd.f32 %v621_v49, %v2826_v56  ;;  %1188 = vmatprep.mubr.f32.mxu1 %v841_v44  ;;  %v842_v3 = vmax.f32 %v620_v48, 0.0 }
 0x176   :  { %v625_v53 = vpop.f32.mrf.mxu0  ;;  %1189 = vmatmul.mubr.f32.gmra.mxu1 %v840_v46 }
 0x177   :  { %v843_v54 = vmax.f32 %v622_v51, 0.0  ;;  %v626_v59 = vadd.f32 %v625_v53, %v2824_v55 }
 0x178   :  { %v627_v60 = vpop.f32.mrf.mxu0 }
 0x179   :  { %v628_v63 = vadd.f32 %v627_v60, %v2826_v56  ;;  %1193 = vmatprep.mubr.f32.mxu1 %v843_v54  ;;  %v844_v5 = vmax.f32 %v626_v59, 0.0  ;;  %v3025_v54 = vpop.f32.mrf.mxu1 }
 0x17a   :  { %v631_v0 = vpop.f32.mrf.mxu0  ;;  %1194 = vmatmul.mubr.f32.gmra.mxu1 %v842_v3 }
 0x17b   :  { %v845_v4 = vmax.f32 %v628_v63, 0.0  ;;  %v632_v7 = vadd.f32 %v631_v0, %v2824_v55 }
 0x17c   :  { %v633_v8 = vpop.f32.mrf.mxu0 }
 0x17d   :  { %v634_v11 = vadd.f32 %v633_v8, %v2826_v56  ;;  %1198 = vmatprep.mubr.f32.mxu1 %v845_v4  ;;  %v846_v16 = vmax.f32 %v632_v7, 0.0  ;;  %v670_v7 = vadd.f32 %v2917_v2, %v2826_v56  ;;  %v674_v2 = vadd.f32 %v2921_v10, %v2824_v55 }
 0x17e   :  { %v637_v13 = vpop.f32.mrf.mxu0  ;;  %1199 = vmatmul.mubr.f32.gmra.mxu1 %v844_v5  ;;  %v3029_v5 = vpop.f32.mrf.mxu1 }
 0x17f   :  { %v847_v15 = vmax.f32 %v634_v11, 0.0  ;;  %v638_v18 = vadd.f32 %v637_v13, %v2824_v55  ;;  %v668_v13 = vadd.f32 %v2907_v58, %v2824_v55  ;;  %v3047_v58 = vld [vmem:[%s3887_s4] ss:$0 sm:$0xff] }
 0x180   :  { %v639_v19 = vpop.f32.mrf.mxu0 }
 0x181   :  { %v640_v23 = vadd.f32 %v639_v19, %v2826_v56  ;;  %1203 = vmatprep.mubr.f32.mxu1 %v847_v15  ;;  %v848_v27 = vmax.f32 %v638_v18, 0.0  ;;  %v859_v18 = vmax.f32 %v670_v7, 0.0  ;;  %v676_v19 = vadd.f32 %v2925_v17, %v2826_v56  ;;  %v3054_v17 = vld [vmem:[%s3888_s6] ss:$0 sm:$0xff] }
 0x182   :  { %v643_v25 = vpop.f32.mrf.mxu0  ;;  %1204 = vmatmul.mubr.f32.gmra.mxu1 %v846_v16  ;;  %v3036_v16 = vpop.f32.mrf.mxu1  ;;  %v698_v7 = vadd.f32 %v2953_v6, %v2824_v55 }
 0x183   :  { %v849_v26 = vmax.f32 %v640_v23, 0.0  ;;  %v644_v28 = vadd.f32 %v643_v25, %v2824_v55  ;;  %v858_v23 = vmax.f32 %v668_v13, 0.0 }
 0x184   :  { %v645_v29 = vpop.f32.mrf.mxu0  ;;  %v3042_v25 = vpop.f32.mrf.mxu1  ;;  %v868_v6 = vmax.f32 %v698_v7, 0.0 }
 0x185   :  { %v646_v34 = vadd.f32 %v645_v29, %v2826_v56  ;;  %1208 = vmatprep.mubr.f32.mxu1 %v849_v26  ;;  %v850_v37 = vmax.f32 %v644_v28, 0.0  ;;  %v861_v26 = vmax.f32 %v676_v19, 0.0  ;;  %v860_v29 = vmax.f32 %v674_v2, 0.0 }
 0x186   :  { %v649_v35 = vpop.f32.mrf.mxu0  ;;  %1209 = vmatmul.mubr.f32.gmra.mxu1 %v848_v27  ;;  %v682_v27 = vadd.f32 %v2933_v31, %v2826_v56  ;;  %v704_v19 = vadd.f32 %v2961_v22, %v2824_v55  ;;  %v712_v2 = vadd.f32 %v2973_v47, %v2826_v56 }
 0x187   :  { %v851_v36 = vmax.f32 %v646_v34, 0.0  ;;  %v650_v40 = vadd.f32 %v649_v35, %v2824_v55  ;;  %v680_v34 = vadd.f32 %v2929_v24, %v2824_v55 }
 0x188   :  { %v651_v42 = vpop.f32.mrf.mxu0  ;;  %v870_v22 = vmax.f32 %v704_v19, 0.0  ;;  %v873_v47 = vmax.f32 %v712_v2, 0.0  ;;  %v740_v19 = vadd.f32 %v3009_v9, %v2824_v55 }
 0x189   :  { %v652_v44 = vadd.f32 %v651_v42, %v2826_v56  ;;  %1213 = vmatprep.mubr.f32.mxu1 %v851_v36  ;;  %v852_v49 = vmax.f32 %v650_v40, 0.0  ;;  %v863_v36 = vmax.f32 %v682_v27, 0.0  ;;  %v862_v24 = vmax.f32 %v680_v34, 0.0 }
 0x18a   :  { %v655_v46 = vpop.f32.mrf.mxu0  ;;  %1214 = vmatmul.mubr.f32.gmra.mxu1 %v850_v37  ;;  %v688_v37 = vadd.f32 %v2941_v45, %v2826_v56  ;;  %v718_v34 = vadd.f32 %v2981_v1, %v2826_v56  ;;  %v882_v9 = vmax.f32 %v740_v19, 0.0 }
 0x18b   :  { %v853_v48 = vmax.f32 %v652_v44, 0.0  ;;  %v656_v51 = vadd.f32 %v655_v46, %v2824_v55  ;;  %v686_v44 = vadd.f32 %v2937_v38, %v2824_v55 }
 0x18c   :  { %v657_v53 = vpop.f32.mrf.mxu0  ;;  %v865_v45 = vmax.f32 %v688_v37, 0.0  ;;  %v875_v1 = vmax.f32 %v718_v34, 0.0 }
 0x18d   :  { %v658_v3 = vadd.f32 %v657_v53, %v2826_v56  ;;  %1218 = vmatprep.mubr.f32.mxu1 %v853_v48  ;;  %v854_v63 = vmax.f32 %v656_v51, 0.0  ;;  %v694_v48 = vadd.f32 %v2949_v61, %v2826_v56  ;;  %v864_v38 = vmax.f32 %v686_v44, 0.0 }
 0x18e   :  { %v661_v59 = vpop.f32.mrf.mxu0  ;;  %1219 = vmatmul.mubr.f32.gmra.mxu1 %v852_v49 }
 0x18f   :  { %v855_v60 = vmax.f32 %v658_v3, 0.0  ;;  %v662_v0 = vadd.f32 %v661_v59, %v2824_v55  ;;  %v692_v3 = vadd.f32 %v2945_v52, %v2824_v55  ;;  %v867_v61 = vmax.f32 %v694_v48, 0.0 }
 0x190   :  { %v663_v4 = vpop.f32.mrf.mxu0  ;;  %v722_v48 = vadd.f32 %v2985_v12, %v2824_v55 }
 0x191   :  { %v664_v8 = vadd.f32 %v663_v4, %v2826_v56  ;;  %1223 = vmatprep.mubr.f32.mxu1 %v855_v60  ;;  %v856_v15 = vmax.f32 %v662_v0, 0.0  ;;  %v700_v60 = vadd.f32 %v2957_v14, %v2826_v56  ;;  %v866_v52 = vmax.f32 %v692_v3, 0.0 }
 0x192   :  { %1224 = vmatmul.mubr.f32.gmra.mxu1 %v854_v63  ;;  %v876_v12 = vmax.f32 %v722_v48, 0.0 }
 0x193   :  { %v857_v11 = vmax.f32 %v664_v8, 0.0  ;;  %v869_v14 = vmax.f32 %v700_v60, 0.0 }
 0x195   :  { %1228 = vmatprep.mubr.f32.mxu1 %v857_v11  ;;  %v706_v11 = vadd.f32 %v2965_v30, %v2826_v56 }
 0x196   :  { %1229 = vmatmul.mubr.f32.gmra.mxu1 %v856_v15 }
 0x197   :  { %1233 = vmatprep.mubr.f32.mxu1 %v859_v18  ;;  %v871_v30 = vmax.f32 %v706_v11, 0.0  ;;  %v742_v11 = vadd.f32 %v3013_v20, %v2826_v56 }
 0x199   :  { %v883_v20 = vmax.f32 %v742_v11, 0.0 }
 0x19a   :  { %v995_v28 = vpop.f32.mrf.mxu1  ;;  %1234 = vmatmul.mubr.f32.gmra.mxu1 %v858_v23 }
 0x19b   :  { %v996_v10 = vadd.f32 %v3047_v58, %v995_v28  ;;  %1238 = vmatprep.mubr.f32.mxu1 %v861_v26 }
 0x19c   :  { %v997_v35 = vpop.f32.mrf.mxu1 }
 0x19d   :  { %2164 = vmatprep.mubr.f32.mxu0 %v996_v10  ;;  %v3062_v31 = vsub.f32 %v996_v10, %v3054_v17  ;;  %v710_v10 = vadd.f32 %v2969_v39, %v2824_v55 }
 0x19e   :  { %v1000_v40 = vpop.f32.mrf.mxu1  ;;  %1239 = vmatmul.mubr.f32.gmra.mxu1 %v860_v29 }
 0x19f   :  { %v1001_v42 = vadd.f32 %v3047_v58, %v1000_v40  ;;  %1243 = vmatprep.mubr.f32.mxu1 %v863_v36  ;;  %1786 = vst [vmem:[%s3889_s7] sm:$0xff] %v3062_v31  ;;  %v872_v39 = vmax.f32 %v710_v10, 0.0  ;;  %v716_v40 = vadd.f32 %v2977_v57, %v2824_v55 }
 0x1a0   :  { %v1002_v46 = vpop.f32.mrf.mxu1 }
 0x1a1   :  { %2165 = vmatmul.mubr.f32.vlgmr.msra.gmra.mxu0 %v1001_v42  ;;  %v3074_v49 = vsub.f32 %v1001_v42, %v3054_v17  ;;  %v874_v57 = vmax.f32 %v716_v40, 0.0  ;;  %v760_v40 = vadd.f32 %v3042_v25, %v2826_v56 }
 0x1a2   :  { %v1005_v51 = vpop.f32.mrf.mxu1  ;;  %1244 = vmatmul.mubr.f32.gmra.mxu1 %v862_v24  ;;  %v724_v24 = vadd.f32 %v2989_v21, %v2826_v56 }
 0x1a3   :  { %v1006_v53 = vadd.f32 %v3047_v58, %v1005_v51  ;;  %1248 = vmatprep.mubr.f32.mxu1 %v865_v45  ;;  %1787 = vst [vmem:[%s3889_s7 + $0x8] sm:$0xff] %v3074_v49 }
 0x1a4   :  { %v1007_v59 = vpop.f32.mrf.mxu1  ;;  %v877_v21 = vmax.f32 %v724_v24, 0.0 }
 0x1a5   :  { %2167 = vmatprep.mubr.f32.mxu0 %v1006_v53  ;;  %v3086_v63 = vsub.f32 %v1006_v53, %v3054_v17  ;;  %v730_v53 = vadd.f32 %v2997_v41, %v2826_v56 }
 0x1a6   :  { %v1010_v0 = vpop.f32.mrf.mxu1  ;;  %1249 = vmatmul.mubr.f32.gmra.mxu1 %v864_v38 }
 0x1a7   :  { %v1011_v4 = vadd.f32 %v3047_v58, %v1010_v0  ;;  %1253 = vmatprep.mubr.f32.mxu1 %v867_v61  ;;  %1788 = vst [vmem:[%s3889_s7 + $0x10] sm:$0xff] %v3086_v63  ;;  %v728_v61 = vadd.f32 %v2993_v32, %v2824_v55  ;;  %v879_v41 = vmax.f32 %v730_v53, 0.0  ;;  %v736_v0 = vadd.f32 %v3005_v62, %v2826_v56 }
 0x1a8   :  { %v1012_v8 = vpop.f32.mrf.mxu1 }
 0x1a9   :  { %2168 = vmatmul.mubr.f32.gmra.mxu0 %v1011_v4  ;;  %v3098_v13 = vsub.f32 %v1011_v4, %v3054_v17  ;;  %v878_v32 = vmax.f32 %v728_v61, 0.0  ;;  %v734_v8 = vadd.f32 %v3001_v50, %v2824_v55  ;;  %v881_v62 = vmax.f32 %v736_v0, 0.0 }
 0x1aa   :  { %v1015_v15 = vpop.f32.mrf.mxu1  ;;  %1254 = vmatmul.mubr.f32.gmra.mxu1 %v866_v52 }
 0x1ab   :  { %v1016_v18 = vadd.f32 %v3047_v58, %v1015_v15  ;;  %1258 = vmatprep.mubr.f32.mxu1 %v869_v14  ;;  %1789 = vst [vmem:[%s3889_s7 + $0x18] sm:$0xff] %v3098_v13  ;;  %v880_v50 = vmax.f32 %v734_v8, 0.0 }
 0x1ac   :  { %v1017_v23 = vpop.f32.mrf.mxu1 }
 0x1ad   :  { %2170 = vmatprep.mubr.f32.mxu0 %v1016_v18  ;;  %v3110_v26 = vsub.f32 %v1016_v18, %v3054_v17 }
 0x1ae   :  { %v1020_v27 = vpop.f32.mrf.mxu1  ;;  %1259 = vmatmul.mubr.f32.gmra.mxu1 %v868_v6 }
 0x1af   :  { %v1021_v28 = vadd.f32 %v3047_v58, %v1020_v27  ;;  %1263 = vmatprep.mubr.f32.mxu1 %v871_v30  ;;  %1790 = vst [vmem:[%s3889_s7 + $0x20] sm:$0xff] %v3110_v26  ;;  %v748_v30 = vadd.f32 %v3021_v43, %v2826_v56 }
 0x1b0   :  { %v1022_v29 = vpop.f32.mrf.mxu1 }
 0x1b1   :  { %2171 = vmatmul.mubr.f32.gmra.mxu0 %v1021_v28  ;;  %v3122_v35 = vsub.f32 %v1021_v28, %v3054_v17  ;;  %v885_v43 = vmax.f32 %v748_v30, 0.0  ;;  %v754_v29 = vadd.f32 %v3029_v5, %v2826_v56  ;;  %v889_v56 = vmax.f32 %v760_v40, 0.0 }
 0x1b2   :  { %v1025_v36 = vpop.f32.mrf.mxu1  ;;  %1264 = vmatmul.mubr.f32.gmra.mxu1 %v870_v22  ;;  %v746_v22 = vadd.f32 %v3017_v33, %v2824_v55 }
 0x1b3   :  { %v1026_v37 = vadd.f32 %v3047_v58, %v1025_v36  ;;  %1268 = vmatprep.mubr.f32.mxu1 %v873_v47  ;;  %1791 = vst [vmem:[%s3889_s7 + $0x28] sm:$0xff] %v3122_v35  ;;  %v887_v5 = vmax.f32 %v754_v29, 0.0 }
 0x1b4   :  { %v1027_v42 = vpop.f32.mrf.mxu1  ;;  %v884_v33 = vmax.f32 %v746_v22, 0.0 }
 0x1b5   :  { %2173 = vmatprep.mubr.f32.mxu0 %v1026_v37  ;;  %v3134_v44 = vsub.f32 %v1026_v37, %v3054_v17  ;;  %v752_v37 = vadd.f32 %v3025_v54, %v2824_v55 }
 0x1b6   :  { %v1030_v46 = vpop.f32.mrf.mxu1  ;;  %1269 = vmatmul.mubr.f32.gmra.mxu1 %v872_v39 }
 0x1b7   :  { %v1031_v45 = vadd.f32 %v3047_v58, %v1030_v46  ;;  %1273 = vmatprep.mubr.f32.mxu1 %v875_v1  ;;  %1792 = vst [vmem:[%s3889_s7 + $0x30] sm:$0xff] %v3134_v44  ;;  %v886_v54 = vmax.f32 %v752_v37, 0.0  ;;  %v758_v46 = vadd.f32 %v3036_v16, %v2824_v55 }
 0x1b8   :  { %v1032_v51 = vpop.f32.mrf.mxu1 }
 0x1b9   :  { %2174 = vmatmul.mubr.f32.gmra.mxu0 %v1031_v45  ;;  %v3146_v38 = vsub.f32 %v1031_v45, %v3054_v17  ;;  %v888_v51 = vmax.f32 %v758_v46, 0.0 }
 0x1ba   :  { %v1035_v3 = vpop.f32.mrf.mxu1  ;;  %1274 = vmatmul.mubr.f32.gmra.mxu1 %v874_v57 }
 0x1bb   :  { %v1036_v59 = vadd.f32 %v3047_v58, %v1035_v3  ;;  %1278 = vmatprep.mubr.f32.mxu1 %v877_v21  ;;  %1793 = vst [vmem:[%s3889_s7 + $0x38] sm:$0xff] %v3146_v38 }
 0x1bc   :  { %v1037_v60 = vpop.f32.mrf.mxu1 }
 0x1bd   :  { %2176 = vmatprep.mubr.f32.mxu0 %v1036_v59  ;;  %v3158_v4 = vsub.f32 %v1036_v59, %v3054_v17 }
 0x1be   :  { %v1040_v52 = vpop.f32.mrf.mxu1  ;;  %1279 = vmatmul.mubr.f32.gmra.mxu1 %v876_v12 }
 0x1bf   :  { %v1041_v7 = vadd.f32 %v3047_v58, %v1040_v52  ;;  %1283 = vmatprep.mubr.f32.mxu1 %v879_v41  ;;  %1794 = vst [vmem:[%s3889_s7 + $0x40] sm:$0xff] %v3158_v4 }
 0x1c0   :  { %v1042_v14 = vpop.f32.mrf.mxu1 }
 0x1c1   :  { %2177 = vmatmul.mubr.f32.gmra.mxu0 %v1041_v7  ;;  %v3170_v15 = vsub.f32 %v1041_v7, %v3054_v17 }
 0x1c2   :  { %v1045_v18 = vpop.f32.mrf.mxu1  ;;  %1284 = vmatmul.mubr.f32.gmra.mxu1 %v878_v32 }
 0x1c3   :  { %v1046_v6 = vadd.f32 %v3047_v58, %v1045_v18  ;;  %1288 = vmatprep.mubr.f32.mxu1 %v881_v62  ;;  %1795 = vst [vmem:[%s3889_s7 + $0x48] sm:$0xff] %v3170_v15 }
 0x1c4   :  { %v1047_v23 = vpop.f32.mrf.mxu1 }
 0x1c5   :  { %2179 = vmatprep.mubr.f32.mxu0 %v1046_v6  ;;  %v3182_v2 = vsub.f32 %v1046_v6, %v3054_v17 }
 0x1c6   :  { %v1050_v27 = vpop.f32.mrf.mxu1  ;;  %1289 = vmatmul.mubr.f32.gmra.mxu1 %v880_v50 }
 0x1c7   :  { %v1051_v28 = vadd.f32 %v3047_v58, %v1050_v27  ;;  %1293 = vmatprep.mubr.f32.mxu1 %v883_v20  ;;  %1796 = vst [vmem:[%s3889_s7 + $0x50] sm:$0xff] %v3182_v2 }
 0x1c8   :  { %v1052_v10 = vpop.f32.mrf.mxu1 }
 0x1c9   :  { %2180 = vmatmul.mubr.f32.gmra.mxu0 %v1051_v28  ;;  %v3194_v47 = vsub.f32 %v1051_v28, %v3054_v17 }
 0x1ca   :  { %v1055_v34 = vpop.f32.mrf.mxu1  ;;  %1294 = vmatmul.mubr.f32.gmra.mxu1 %v882_v9 }
 0x1cb   :  { %v1056_v36 = vadd.f32 %v3047_v58, %v1055_v34  ;;  %1298 = vmatprep.mubr.f32.mxu1 %v885_v43  ;;  %1797 = vst [vmem:[%s3889_s7 + $0x58] sm:$0xff] %v3194_v47 }
 0x1cc   :  { %v1057_v39 = vpop.f32.mrf.mxu1 }
 0x1cd   :  { %2182 = vmatprep.mubr.f32.mxu0 %v1056_v36  ;;  %v3206_v42 = vsub.f32 %v1056_v36, %v3054_v17 }
 0x1ce   :  { %v1060_v1 = vpop.f32.mrf.mxu1  ;;  %1299 = vmatmul.mubr.f32.gmra.mxu1 %v884_v33 }
 0x1cf   :  { %v1061_v24 = vadd.f32 %v3047_v58, %v1060_v1  ;;  %1303 = vmatprep.mubr.f32.mxu1 %v887_v5  ;;  %1798 = vst [vmem:[%s3889_s7 + $0x60] sm:$0xff] %v3206_v42 }
 0x1d0   :  { %v1062_v45 = vpop.f32.mrf.mxu1 }
 0x1d1   :  { %2183 = vmatmul.mubr.f32.gmra.mxu0 %v1061_v24  ;;  %v3216_v25 = vsub.f32 %v1061_v24, %v3054_v17 }
 0x1d2   :  { %v1065_v57 = vpop.f32.mrf.mxu1  ;;  %1304 = vmatmul.mubr.f32.gmra.mxu1 %v886_v54 }
 0x1d3   :  { %v1066_v48 = vadd.f32 %v3047_v58, %v1065_v57  ;;  %1308 = vmatprep.mubr.f32.mxu1 %v889_v56  ;;  %1799 = vst [vmem:[%s3889_s7 + $0x68] sm:$0xff] %v3216_v25 }
 0x1d4   :  { %v1067_v21 = vpop.f32.mrf.mxu1 }
 0x1d5   :  { %2185 = vmatprep.mubr.f32.mxu0 %v1066_v48  ;;  %v3224_v55 = vsub.f32 %v1066_v48, %v3054_v17 }
 0x1d6   :  { %v1070_v16 = vpop.f32.mrf.mxu1  ;;  %1309 = vmatmul.mubr.f32.gmra.mxu1 %v888_v51 }
 0x1d7   :  { %v1071_v53 = vadd.f32 %v3047_v58, %v1070_v16  ;;  %1800 = vst [vmem:[%s3889_s7 + $0x70] sm:$0xff] %v3224_v55 }
 0x1d8   :  { %v1072_v3 = vpop.f32.mrf.mxu1 }
 0x1d9   :  { %2186 = vmatmul.mubr.f32.gmra.mxu0 %v1071_v53  ;;  %v3232_v59 = vsub.f32 %v1071_v53, %v3054_v17 }
 0x1da   :  { %v1075_v12 = vpop.f32.mrf.mxu1 }
 0x1db   :  { %v1076_v61 = vadd.f32 %v3047_v58, %v1075_v12  ;;  %1801 = vst [vmem:[%s3889_s7 + $0x78] sm:$0xff] %v3232_v59 }
 0x1dc   :  { %v1077_v60 = vpop.f32.mrf.mxu1 }
 0x1dd   :  { %2188 = vmatprep.mubr.f32.mxu0 %v1076_v61  ;;  %v3240_v41 = vsub.f32 %v1076_v61, %v3054_v17 }
 0x1de   :  { %v1080_v0 = vpop.f32.mrf.mxu1 }
 0x1df   :  { %v1081_v52 = vadd.f32 %v3047_v58, %v1080_v0  ;;  %1802 = vst [vmem:[%s3889_s7 + $0x80] sm:$0xff] %v3240_v41 }
 0x1e0   :  { %v1082_v7 = vpop.f32.mrf.mxu1 }
 0x1e1   :  { %2189 = vmatmul.mubr.f32.gmra.mxu0 %v1081_v52  ;;  %v3248_v32 = vsub.f32 %v1081_v52, %v3054_v17 }
 0x1e2   :  { %v1085_v8 = vpop.f32.mrf.mxu1 }
 0x1e3   :  { %v1086_v14 = vadd.f32 %v3047_v58, %v1085_v8  ;;  %1803 = vst [vmem:[%s3889_s7 + $0x88] sm:$0xff] %v3248_v32 }
 0x1e4   :  { %v1087_v62 = vpop.f32.mrf.mxu1 }
 0x1e5   :  { %2191 = vmatprep.mubr.f32.mxu0 %v1086_v14  ;;  %v3256_v11 = vsub.f32 %v1086_v14, %v3054_v17 }
 0x1e6   :  { %v1090_v18 = vpop.f32.mrf.mxu1 }
 0x1e7   :  { %v1091_v6 = vadd.f32 %v3047_v58, %v1090_v18  ;;  %1804 = vst [vmem:[%s3889_s7 + $0x90] sm:$0xff] %v3256_v11 }
 0x1e8   :  { %v1092_v50 = vpop.f32.mrf.mxu1 }
 0x1e9   :  { %2192 = vmatmul.mubr.f32.gmra.mxu0 %v1091_v6  ;;  %v3264_v19 = vsub.f32 %v1091_v6, %v3054_v17 }
 0x1ea   :  { %v1095_v23 = vpop.f32.mrf.mxu1 }
 0x1eb   :  { %v1096_v20 = vadd.f32 %v3047_v58, %v1095_v23  ;;  %1805 = vst [vmem:[%s3889_s7 + $0x98] sm:$0xff] %v3264_v19 }
 0x1ec   :  { %v1097_v30 = vpop.f32.mrf.mxu1 }
 0x1ed   :  { %2194 = vmatprep.mubr.f32.mxu0 %v1096_v20  ;;  %v3272_v27 = vsub.f32 %v1096_v20, %v3054_v17 }
 0x1ee   :  { %v1100_v28 = vpop.f32.mrf.mxu1 }
 0x1ef   :  { %v1101_v9 = vadd.f32 %v3047_v58, %v1100_v28  ;;  %1806 = vst [vmem:[%s3889_s7 + $0xa0] sm:$0xff] %v3272_v27 }
 0x1f0   :  { %v1102_v22 = vpop.f32.mrf.mxu1 }
 0x1f1   :  { %2195 = vmatmul.mubr.f32.gmra.mxu0 %v1101_v9  ;;  %v3280_v10 = vsub.f32 %v1101_v9, %v3054_v17 }
 0x1f2   :  { %v1105_v43 = vpop.f32.mrf.mxu1 }
 0x1f3   :  { %v1106_v29 = vadd.f32 %v3047_v58, %v1105_v43  ;;  %1807 = vst [vmem:[%s3889_s7 + $0xa8] sm:$0xff] %v3280_v10 }
 0x1f4   :  { %v1107_v34 = vpop.f32.mrf.mxu1 }
 0x1f5   :  { %2197 = vmatprep.mubr.f32.mxu0 %v1106_v29  ;;  %v3288_v36 = vsub.f32 %v1106_v29, %v3054_v17 }
 0x1f6   :  { %v1110_v33 = vpop.f32.mrf.mxu1 }
 0x1f7   :  { %v1111_v37 = vadd.f32 %v3047_v58, %v1110_v33  ;;  %1808 = vst [vmem:[%s3889_s7 + $0xb0] sm:$0xff] %v3288_v36 }
 0x1f8   :  { %v1112_v39 = vpop.f32.mrf.mxu1 }
 0x1f9   :  { %2198 = vmatmul.mubr.f32.gmra.mxu0 %v1111_v37  ;;  %v3296_v5 = vsub.f32 %v1111_v37, %v3054_v17 }
 0x1fa   :  { %v1115_v40 = vpop.f32.mrf.mxu1 }
 0x1fb   :  { %v1116_v1 = vadd.f32 %v3047_v58, %v1115_v40  ;;  %1809 = vst [vmem:[%s3889_s7 + $0xb8] sm:$0xff] %v3296_v5 }
 0x1fc   :  { %v1117_v24 = vpop.f32.mrf.mxu1 }
 0x1fd   :  { %2200 = vmatprep.mubr.f32.mxu0 %v1116_v1  ;;  %v3304_v54 = vsub.f32 %v1116_v1, %v3054_v17 }
 0x1fe   :  { %v1120_v46 = vpop.f32.mrf.mxu1 }
 0x1ff   :  { %v1121_v45 = vadd.f32 %v3047_v58, %v1120_v46  ;;  %1810 = vst [vmem:[%s3889_s7 + $0xc0] sm:$0xff] %v3304_v54 }
 0x200   :  { %v1122_v56 = vpop.f32.mrf.mxu1 }
 0x201   :  { %2201 = vmatmul.mubr.f32.gmra.mxu0 %v1121_v45  ;;  %v3312_v57 = vsub.f32 %v1121_v45, %v3054_v17 }
 0x202   :  { %v1125_v48 = vpop.f32.mrf.mxu1 }
 0x203   :  { %v1126_v51 = vadd.f32 %v3047_v58, %v1125_v48  ;;  %1811 = vst [vmem:[%s3889_s7 + $0xc8] sm:$0xff] %v3312_v57 }
 0x204   :  { %v1127_v21 = vpop.f32.mrf.mxu1 }
 0x205   :  { %2203 = vmatprep.mubr.f32.mxu0 %v1126_v51  ;;  %v3320_v16 = vsub.f32 %v1126_v51, %v3054_v17 }
 0x206   :  { %v1130_v53 = vpop.f32.mrf.mxu1 }
 0x207   :  { %v1131_v3 = vadd.f32 %v3047_v58, %v1130_v53  ;;  %1812 = vst [vmem:[%s3889_s7 + $0xd0] sm:$0xff] %v3320_v16 }
 0x208   :  { %v1132_v12 = vpop.f32.mrf.mxu1 }
 0x209   :  { %2204 = vmatmul.mubr.f32.gmra.mxu0 %v1131_v3  ;;  %v3328_v61 = vsub.f32 %v1131_v3, %v3054_v17 }
 0x20a   :  { %v1135_v60 = vpop.f32.mrf.mxu1 }
 0x20b   :  { %v1136_v0 = vadd.f32 %v3047_v58, %v1135_v60  ;;  %1813 = vst [vmem:[%s3889_s7 + $0xd8] sm:$0xff] %v3328_v61 }
 0x20c   :  { %v1137_v52 = vpop.f32.mrf.mxu1 }
 0x20d   :  { %2206 = vmatprep.mubr.f32.mxu0 %v1136_v0  ;;  %v3336_v7 = vsub.f32 %v1136_v0, %v3054_v17 }
 0x20e   :  { %v1140_v8 = vpop.f32.mrf.mxu1 }
 0x20f   :  { %v1141_v14 = vadd.f32 %v3047_v58, %v1140_v8  ;;  %1814 = vst [vmem:[%s3889_s7 + $0xe0] sm:$0xff] %v3336_v7 }
 0x210   :  { %v1142_v62 = vpop.f32.mrf.mxu1 }
 0x211   :  { %2207 = vmatmul.mubr.f32.gmra.mxu0 %v1141_v14  ;;  %v3344_v18 = vsub.f32 %v1141_v14, %v3054_v17 }
 0x212   :  { %v1145_v6 = vpop.f32.mrf.mxu1 }
 0x213   :  { %v1146_v50 = vadd.f32 %v3047_v58, %v1145_v6  ;;  %1815 = vst [vmem:[%s3889_s7 + $0xe8] sm:$0xff] %v3344_v18 }
 0x214   :  { %v1147_v23 = vpop.f32.mrf.mxu1 }
 0x215   :  { %2209 = vmatprep.mubr.f32.mxu0 %v1146_v50  ;;  %v3352_v20 = vsub.f32 %v1146_v50, %v3054_v17 }
 0x216   :  { %v1150_v30 = vpop.f32.mrf.mxu1 }
 0x217   :  { %v1151_v28 = vadd.f32 %v3047_v58, %v1150_v30  ;;  %1816 = vst [vmem:[%s3889_s7 + $0xf0] sm:$0xff] %v3352_v20 }
 0x218   :  { %v1152_v9 = vpop.f32.mrf.mxu1 }
 0x219   :  { %2210 = vmatmul.mubr.f32.gmra.mxu0 %v1151_v28  ;;  %v3360_v22 = vsub.f32 %v1151_v28, %v3054_v17 }
 0x21a   :  { %v1155_v43 = vpop.f32.mrf.mxu1 }
 0x21b   :  { %v1156_v29 = vadd.f32 %v3047_v58, %v1155_v43  ;;  %1817 = vst [vmem:[%s3889_s7 + $0xf8] sm:$0xff] %v3360_v22 }
 0x21c   :  { %v1157_v34 = vpop.f32.mrf.mxu1 }
 0x21d   :  { %2212 = vmatprep.mubr.f32.mxu0 %v1156_v29  ;;  %v3368_v33 = vsub.f32 %v1156_v29, %v3054_v17 }
 0x21e   :  { %v1160_v37 = vpop.f32.mrf.mxu1 }
 0x21f   :  { %v1161_v39 = vadd.f32 %v3047_v58, %v1160_v37  ;;  %1818 = vst [vmem:[%s3889_s7 + $0x100] sm:$0xff] %v3368_v33 }
 0x220   :  { %v1162_v40 = vpop.f32.mrf.mxu1 }
 0x221   :  { %2213 = vmatmul.mubr.f32.gmra.mxu0 %v1161_v39  ;;  %v3376_v1 = vsub.f32 %v1161_v39, %v3054_v17 }
 0x222   :  { %v1165_v24 = vpop.f32.mrf.mxu1 }
 0x223   :  { %v1166_v46 = vadd.f32 %v3047_v58, %v1165_v24  ;;  %1819 = vst [vmem:[%s3889_s7 + $0x108] sm:$0xff] %v3376_v1 }
 0x224   :  { %v1167_v45 = vpop.f32.mrf.mxu1 }
 0x225   :  { %2215 = vmatprep.mubr.f32.mxu0 %v1166_v46  ;;  %v3384_v56 = vsub.f32 %v1166_v46, %v3054_v17 }
 0x226   :  { %v1170_v48 = vpop.f32.mrf.mxu1 }
 0x227   :  { %v1171_v51 = vadd.f32 %v3047_v58, %v1170_v48  ;;  %1820 = vst [vmem:[%s3889_s7 + $0x110] sm:$0xff] %v3384_v56 }
 0x228   :  { %v1172_v21 = vpop.f32.mrf.mxu1 }
 0x229   :  { %2216 = vmatmul.mubr.f32.gmra.mxu0 %v1171_v51  ;;  %v3392_v53 = vsub.f32 %v1171_v51, %v3054_v17 }
 0x22a   :  { %v1175_v3 = vpop.f32.mrf.mxu1 }
 0x22b   :  { %v1176_v12 = vadd.f32 %v3047_v58, %v1175_v3  ;;  %1821 = vst [vmem:[%s3889_s7 + $0x118] sm:$0xff] %v3392_v53 }
 0x22c   :  { %v1177_v60 = vpop.f32.mrf.mxu1 }
 0x22d   :  { %2218 = vmatprep.mubr.f32.mxu0 %v1176_v12  ;;  %v3400_v0 = vsub.f32 %v1176_v12, %v3054_v17 }
 0x22e   :  { %v1180_v52 = vpop.f32.mrf.mxu1 }
 0x22f   :  { %v1181_v8 = vadd.f32 %v3047_v58, %v1180_v52  ;;  %1822 = vst [vmem:[%s3889_s7 + $0x120] sm:$0xff] %v3400_v0 }
 0x230   :  { %v1182_v14 = vpop.f32.mrf.mxu1 }
 0x231   :  { %2219 = vmatmul.mubr.f32.gmra.mxu0 %v1181_v8  ;;  %v3408_v62 = vsub.f32 %v1181_v8, %v3054_v17 }
 0x232   :  { %v1185_v6 = vpop.f32.mrf.mxu1 }
 0x233   :  { %v1186_v50 = vadd.f32 %v3047_v58, %v1185_v6  ;;  %1823 = vst [vmem:[%s3889_s7 + $0x128] sm:$0xff] %v3408_v62 }
 0x234   :  { %v1187_v23 = vpop.f32.mrf.mxu1 }
 0x235   :  { %2221 = vmatprep.mubr.f32.mxu0 %v1186_v50  ;;  %v3416_v30 = vsub.f32 %v1186_v50, %v3054_v17 }
 0x236   :  { %v1190_v28 = vpop.f32.mrf.mxu1 }
 0x237   :  { %v1191_v9 = vadd.f32 %v3047_v58, %v1190_v28  ;;  %1824 = vst [vmem:[%s3889_s7 + $0x130] sm:$0xff] %v3416_v30 }
 0x238   :  { %v1192_v43 = vpop.f32.mrf.mxu1 }
 0x239   :  { %2222 = vmatmul.mubr.f32.gmra.mxu0 %v1191_v9  ;;  %v3424_v29 = vsub.f32 %v1191_v9, %v3054_v17 }
 0x23a   :  { %v1195_v34 = vpop.f32.mrf.mxu1 }
 0x23b   :  { %v1196_v37 = vadd.f32 %v3047_v58, %v1195_v34  ;;  %1825 = vst [vmem:[%s3889_s7 + $0x138] sm:$0xff] %v3424_v29 }
 0x23c   :  { %v1197_v39 = vpop.f32.mrf.mxu1 }
 0x23d   :  { %2224 = vmatprep.mubr.f32.mxu0 %v1196_v37  ;;  %v3432_v40 = vsub.f32 %v1196_v37, %v3054_v17 }
 0x23e   :  { %v1200_v24 = vpop.f32.mrf.mxu1 }
 0x23f   :  { %v1201_v46 = vadd.f32 %v3047_v58, %v1200_v24  ;;  %1826 = vst [vmem:[%s3889_s7 + $0x140] sm:$0xff] %v3432_v40 }
 0x240   :  { %v1202_v45 = vpop.f32.mrf.mxu1 }
 0x241   :  { %2225 = vmatmul.mubr.f32.gmra.mxu0 %v1201_v46  ;;  %v3440_v48 = vsub.f32 %v1201_v46, %v3054_v17 }
 0x242   :  { %v1205_v51 = vpop.f32.mrf.mxu1 }
 0x243   :  { %v1206_v21 = vadd.f32 %v3047_v58, %v1205_v51  ;;  %1827 = vst [vmem:[%s3889_s7 + $0x148] sm:$0xff] %v3440_v48 }
 0x244   :  { %v1207_v3 = vpop.f32.mrf.mxu1 }
 0x245   :  { %2227 = vmatprep.mubr.f32.mxu0 %v1206_v21  ;;  %v3448_v12 = vsub.f32 %v1206_v21, %v3054_v17 }
 0x246   :  { %v1210_v60 = vpop.f32.mrf.mxu1 }
 0x247   :  { %v1211_v52 = vadd.f32 %v3047_v58, %v1210_v60  ;;  %1828 = vst [vmem:[%s3889_s7 + $0x150] sm:$0xff] %v3448_v12 }
 0x248   :  { %v1212_v8 = vpop.f32.mrf.mxu1 }
 0x249   :  { %2228 = vmatmul.mubr.f32.gmra.mxu0 %v1211_v52  ;;  %v3456_v14 = vsub.f32 %v1211_v52, %v3054_v17 }
 0x24a   :  { %v1215_v6 = vpop.f32.mrf.mxu1 }
 0x24b   :  { %v1216_v50 = vadd.f32 %v3047_v58, %v1215_v6  ;;  %1829 = vst [vmem:[%s3889_s7 + $0x158] sm:$0xff] %v3456_v14 }
 0x24c   :  { %v1217_v23 = vpop.f32.mrf.mxu1 }
 0x24d   :  { %2230 = vmatprep.mubr.f32.mxu0 %v1216_v50  ;;  %v3464_v28 = vsub.f32 %v1216_v50, %v3054_v17 }
 0x24e   :  { %v1220_v9 = vpop.f32.mrf.mxu1 }
 0x24f   :  { %v1221_v43 = vadd.f32 %v3047_v58, %v1220_v9  ;;  %1830 = vst [vmem:[%s3889_s7 + $0x160] sm:$0xff] %v3464_v28 }
 0x250   :  { %v1222_v34 = vpop.f32.mrf.mxu1 }
 0x251   :  { %2231 = vmatmul.mubr.f32.gmra.mxu0 %v1221_v43  ;;  %v3472_v37 = vsub.f32 %v1221_v43, %v3054_v17 }
 0x252   :  { %v1225_v39 = vpop.f32.mrf.mxu1 }
 0x253   :  { %v1226_v24 = vadd.f32 %v3047_v58, %v1225_v39  ;;  %1831 = vst [vmem:[%s3889_s7 + $0x168] sm:$0xff] %v3472_v37 }
 0x254   :  { %v1227_v46 = vpop.f32.mrf.mxu1 }
 0x255   :  { %2233 = vmatprep.mubr.f32.mxu0 %v1226_v24  ;;  %v3480_v45 = vsub.f32 %v1226_v24, %v3054_v17 }
 0x256   :  { %v1230_v51 = vpop.f32.mrf.mxu1 }
 0x257   :  { %v1231_v21 = vadd.f32 %v3047_v58, %v1230_v51  ;;  %1832 = vst [vmem:[%s3889_s7 + $0x170] sm:$0xff] %v3480_v45 }
 0x258   :  { %v1232_v3 = vpop.f32.mrf.mxu1 }
 0x259   :  { %2234 = vmatmul.mubr.f32.gmra.mxu0 %v1231_v21  ;;  %v3488_v60 = vsub.f32 %v1231_v21, %v3054_v17 }
 0x25a   :  { %v1235_v52 = vpop.f32.mrf.mxu1 }
 0x25b   :  { %v1236_v8 = vadd.f32 %v3047_v58, %v1235_v52  ;;  %1833 = vst [vmem:[%s3889_s7 + $0x178] sm:$0xff] %v3488_v60 }
 0x25c   :  { %v1237_v6 = vpop.f32.mrf.mxu1 }
 0x25d   :  { %2236 = vmatprep.mubr.f32.mxu0 %v1236_v8  ;;  %v3496_v50 = vsub.f32 %v1236_v8, %v3054_v17 }
 0x25e   :  { %v1240_v23 = vpop.f32.mrf.mxu1 }
 0x25f   :  { %v1241_v9 = vadd.f32 %v3047_v58, %v1240_v23  ;;  %1834 = vst [vmem:[%s3889_s7 + $0x180] sm:$0xff] %v3496_v50 }
 0x260   :  { %v1242_v43 = vpop.f32.mrf.mxu1 }
 0x261   :  { %v2166_v34 = vpop.f32.mrf.mxu0  ;;  %2237 = vmatmul.mubr.f32.gmra.mxu0 %v1241_v9  ;;  %v3504_v39 = vsub.f32 %v1241_v9, %v3054_v17 }
 0x262   :  { %v1851_v24 = vsub.f32 %v3074_v49, %v2166_v34  ;;  %v1245_v46 = vpop.f32.mrf.mxu1 }
 0x263   :  { %v1246_v51 = vadd.f32 %v3047_v58, %v1245_v46  ;;  %v1396_v21 = vpop.f32.mrf.mxu0  ;;  %1835 = vst [vmem:[%s3889_s7 + $0x188] sm:$0xff] %v3504_v39 }
 0x264   :  { %1915 = vst [vmem:[%s3890_s8 + $0x8] sm:$0xff] %v1851_v24  ;;  %v1850_v3 = vsub.f32 %v3062_v31, %v1396_v21  ;;  %v1247_v52 = vpop.f32.mrf.mxu1 }
 0x265   :  { %2239 = vmatprep.mubr.f32.mxu0 %v1246_v51  ;;  %v3517_v8 = vsub.f32 %v1246_v51, %v3054_v17 }
 0x266   :  { %1914 = vst [vmem:[%s3890_s8] sm:$0xff] %v1850_v3  ;;  %v1250_v49 = vpop.f32.mrf.mxu1 }
 0x267   :  { %v1251_v6 = vadd.f32 %v3047_v58, %v1250_v49  ;;  %1836 = vst [vmem:[%s3889_s7 + $0x190] sm:$0xff] %v3517_v8 }
 0x268   :  { %v1252_v23 = vpop.f32.mrf.mxu1 }
 0x269   :  { %v2169_v9 = vpop.f32.mrf.mxu0  ;;  %2240 = vmatmul.mubr.f32.gmra.mxu0 %v1251_v6  ;;  %v3528_v31 = vsub.f32 %v1251_v6, %v3054_v17 }
 0x26a   :  { %v1853_v43 = vsub.f32 %v3098_v13, %v2169_v9  ;;  %v1255_v34 = vpop.f32.mrf.mxu1 }
 0x26b   :  { %v1256_v24 = vadd.f32 %v3047_v58, %v1255_v34  ;;  %v1406_v46 = vpop.f32.mrf.mxu0  ;;  %1837 = vst [vmem:[%s3889_s7 + $0x198] sm:$0xff] %v3528_v31 }
 0x26c   :  { %1917 = vst [vmem:[%s3890_s8 + $0x18] sm:$0xff] %v1853_v43  ;;  %v1852_v51 = vsub.f32 %v3086_v63, %v1406_v46  ;;  %v1257_v21 = vpop.f32.mrf.mxu1 }
 0x26d   :  { %2242 = vmatprep.mubr.f32.mxu0 %v1256_v24  ;;  %v3541_v3 = vsub.f32 %v1256_v24, %v3054_v17 }
 0x26e   :  { %1916 = vst [vmem:[%s3890_s8 + $0x10] sm:$0xff] %v1852_v51  ;;  %v1260_v13 = vpop.f32.mrf.mxu1 }
 0x26f   :  { %v1261_v52 = vadd.f32 %v3047_v58, %v1260_v13  ;;  %1838 = vst [vmem:[%s3889_s7 + $0x1a0] sm:$0xff] %v3541_v3 }
 0x270   :  { %v1262_v49 = vpop.f32.mrf.mxu1 }
 0x271   :  { %v2172_v6 = vpop.f32.mrf.mxu0  ;;  %2243 = vmatmul.mubr.f32.gmra.mxu0 %v1261_v52  ;;  %v3552_v63 = vsub.f32 %v1261_v52, %v3054_v17 }
 0x272   :  { %v1855_v23 = vsub.f32 %v3122_v35, %v2172_v6  ;;  %v1265_v9 = vpop.f32.mrf.mxu1 }
 0x273   :  { %v1266_v43 = vadd.f32 %v3047_v58, %v1265_v9  ;;  %v1416_v34 = vpop.f32.mrf.mxu0  ;;  %1839 = vst [vmem:[%s3889_s7 + $0x1a8] sm:$0xff] %v3552_v63 }
 0x274   :  { %1919 = vst [vmem:[%s3890_s8 + $0x28] sm:$0xff] %v1855_v23  ;;  %v1854_v24 = vsub.f32 %v3110_v26, %v1416_v34  ;;  %v1267_v46 = vpop.f32.mrf.mxu1 }
 0x275   :  { %2245 = vmatprep.mubr.f32.mxu0 %v1266_v43  ;;  %v3565_v51 = vsub.f32 %v1266_v43, %v3054_v17 }
 0x276   :  { %1918 = vst [vmem:[%s3890_s8 + $0x20] sm:$0xff] %v1854_v24  ;;  %v1270_v35 = vpop.f32.mrf.mxu1 }
 0x277   :  { %v1271_v21 = vadd.f32 %v3047_v58, %v1270_v35  ;;  %1840 = vst [vmem:[%s3889_s7 + $0x1b0] sm:$0xff] %v3565_v51 }
 0x278   :  { %v1272_v13 = vpop.f32.mrf.mxu1 }
 0x279   :  { %v2175_v52 = vpop.f32.mrf.mxu0  ;;  %2246 = vmatmul.mubr.f32.gmra.mxu0 %v1271_v21  ;;  %v3576_v26 = vsub.f32 %v1271_v21, %v3054_v17 }
 0x27a   :  { %v1857_v49 = vsub.f32 %v3146_v38, %v2175_v52  ;;  %v1275_v6 = vpop.f32.mrf.mxu1 }
 0x27b   :  { %v1276_v23 = vadd.f32 %v3047_v58, %v1275_v6  ;;  %v1426_v9 = vpop.f32.mrf.mxu0  ;;  %1841 = vst [vmem:[%s3889_s7 + $0x1b8] sm:$0xff] %v3576_v26 }
 0x27c   :  { %1921 = vst [vmem:[%s3890_s8 + $0x38] sm:$0xff] %v1857_v49  ;;  %v1856_v43 = vsub.f32 %v3134_v44, %v1426_v9  ;;  %v1277_v34 = vpop.f32.mrf.mxu1 }
 0x27d   :  { %2248 = vmatprep.mubr.f32.mxu0 %v1276_v23  ;;  %v3589_v24 = vsub.f32 %v1276_v23, %v3054_v17 }
 0x27e   :  { %1920 = vst [vmem:[%s3890_s8 + $0x30] sm:$0xff] %v1856_v43  ;;  %v1280_v38 = vpop.f32.mrf.mxu1 }
 0x27f   :  { %v1281_v46 = vadd.f32 %v3047_v58, %v1280_v38  ;;  %1842 = vst [vmem:[%s3889_s7 + $0x1c0] sm:$0xff] %v3589_v24 }
 0x280   :  { %v1282_v35 = vpop.f32.mrf.mxu1 }
 0x281   :  { %v2178_v21 = vpop.f32.mrf.mxu0  ;;  %2249 = vmatmul.mubr.f32.gmra.mxu0 %v1281_v46  ;;  %v3600_v44 = vsub.f32 %v1281_v46, %v3054_v17 }
 0x282   :  { %v1859_v13 = vsub.f32 %v3170_v15, %v2178_v21  ;;  %v1285_v52 = vpop.f32.mrf.mxu1 }
 0x283   :  { %v1286_v49 = vadd.f32 %v3047_v58, %v1285_v52  ;;  %v1436_v6 = vpop.f32.mrf.mxu0  ;;  %1843 = vst [vmem:[%s3889_s7 + $0x1c8] sm:$0xff] %v3600_v44 }
 0x284   :  { %1923 = vst [vmem:[%s3890_s8 + $0x48] sm:$0xff] %v1859_v13  ;;  %v1858_v23 = vsub.f32 %v3158_v4, %v1436_v6  ;;  %v1287_v9 = vpop.f32.mrf.mxu1 }
 0x285   :  { %2251 = vmatprep.mubr.f32.mxu0 %v1286_v49  ;;  %v3613_v43 = vsub.f32 %v1286_v49, %v3054_v17 }
 0x286   :  { %1922 = vst [vmem:[%s3890_s8 + $0x40] sm:$0xff] %v1858_v23  ;;  %v1290_v15 = vpop.f32.mrf.mxu1 }
 0x287   :  { %v1291_v34 = vadd.f32 %v3047_v58, %v1290_v15  ;;  %1844 = vst [vmem:[%s3889_s7 + $0x1d0] sm:$0xff] %v3613_v43 }
 0x288   :  { %v1292_v38 = vpop.f32.mrf.mxu1 }
 0x289   :  { %v2181_v46 = vpop.f32.mrf.mxu0  ;;  %2252 = vmatmul.mubr.f32.gmra.mxu0 %v1291_v34  ;;  %v3624_v4 = vsub.f32 %v1291_v34, %v3054_v17 }
 0x28a   :  { %v1861_v35 = vsub.f32 %v3194_v47, %v2181_v46  ;;  %v1295_v21 = vpop.f32.mrf.mxu1 }
 0x28b   :  { %v1296_v13 = vadd.f32 %v3047_v58, %v1295_v21  ;;  %v1446_v52 = vpop.f32.mrf.mxu0  ;;  %1845 = vst [vmem:[%s3889_s7 + $0x1d8] sm:$0xff] %v3624_v4 }
 0x28c   :  { %1925 = vst [vmem:[%s3890_s8 + $0x58] sm:$0xff] %v1861_v35  ;;  %v1860_v49 = vsub.f32 %v3182_v2, %v1446_v52  ;;  %v1297_v6 = vpop.f32.mrf.mxu1 }
 0x28d   :  { %2254 = vmatprep.mubr.f32.mxu0 %v1296_v13  ;;  %v3637_v23 = vsub.f32 %v1296_v13, %v3054_v17 }
 0x28e   :  { %1924 = vst [vmem:[%s3890_s8 + $0x50] sm:$0xff] %v1860_v49  ;;  %v1300_v47 = vpop.f32.mrf.mxu1 }
 0x28f   :  { %v1301_v9 = vadd.f32 %v3047_v58, %v1300_v47  ;;  %1846 = vst [vmem:[%s3889_s7 + $0x1e0] sm:$0xff] %v3637_v23 }
 0x290   :  { %v1302_v15 = vpop.f32.mrf.mxu1 }
 0x291   :  { %v2184_v34 = vpop.f32.mrf.mxu0  ;;  %2255 = vmatmul.mubr.f32.gmra.mxu0 %v1301_v9  ;;  %v3648_v2 = vsub.f32 %v1301_v9, %v3054_v17 }
 0x292   :  { %v1863_v38 = vsub.f32 %v3216_v25, %v2184_v34  ;;  %v1305_v46 = vpop.f32.mrf.mxu1  ;;  %v2277_v25 = vld [vmem:[%s3887_s4] ss:$0 sm:$0xff] }
 0x293   :  { %v1306_v35 = vadd.f32 %v3047_v58, %v1305_v46  ;;  %v1456_v21 = vpop.f32.mrf.mxu0  ;;  %1847 = vst [vmem:[%s3889_s7 + $0x1e8] sm:$0xff] %v3648_v2 }
 0x294   :  { %1927 = vst [vmem:[%s3890_s8 + $0x68] sm:$0xff] %v1863_v38  ;;  %v1862_v13 = vsub.f32 %v3206_v42, %v1456_v21  ;;  %v1307_v52 = vpop.f32.mrf.mxu1 }
 0x295   :  { %2257 = vmatprep.mubr.f32.mxu0 %v1306_v35  ;;  %v3661_v49 = vsub.f32 %v1306_v35, %v3054_v17  ;;  %v2278_v17 = vld [vmem:[%s3888_s6] ss:$0 sm:$0xff] }
 0x296   :  { %1926 = vst [vmem:[%s3890_s8 + $0x60] sm:$0xff] %v1862_v13  ;;  %v1310_v58 = vpop.f32.mrf.mxu1 }
 0x297   :  { %v1311_v6 = vadd.f32 %v2277_v25, %v1310_v58  ;;  %1848 = vst [vmem:[%s3889_s7 + $0x1f0] sm:$0xff] %v3661_v49 }
 0x298   :  { %v1312_v42 = vpop.f32.mrf.mxu1 }
 0x299   :  { %v2187_v47 = vpop.f32.mrf.mxu0  ;;  %2258 = vmatmul.mubr.f32.gmra.mxu0 %v1311_v6  ;;  %v3676_v9 = vsub.f32 %v1311_v6, %v2278_v17 }
 0x29a   :  { %v1865_v15 = vsub.f32 %v3232_v59, %v2187_v47 }
 0x29b   :  { %v1466_v34 = vpop.f32.mrf.mxu0  ;;  %1849 = vst [vmem:[%s3889_s7 + $0x1f8] sm:$0xff] %v3676_v9 }
 0x29c   :  { %1929 = vst [vmem:[%s3890_s8 + $0x78] sm:$0xff] %v1865_v15  ;;  %v1864_v38 = vsub.f32 %v3224_v55, %v1466_v34 }
 0x29e   :  { %1928 = vst [vmem:[%s3890_s8 + $0x70] sm:$0xff] %v1864_v38 }
 0x2a1   :  { %v2190_v46 = vpop.f32.mrf.mxu0 }
 0x2a2   :  { %v1867_v35 = vsub.f32 %v3248_v32, %v2190_v46 }
 0x2a3   :  { %v1476_v59 = vpop.f32.mrf.mxu0 }
 0x2a4   :  { %1931 = vst [vmem:[%s3890_s8 + $0x88] sm:$0xff] %v1867_v35  ;;  %v1866_v21 = vsub.f32 %v3240_v41, %v1476_v59 }
 0x2a6   :  { %1930 = vst [vmem:[%s3890_s8 + $0x80] sm:$0xff] %v1866_v21 }
 0x2a9   :  { %v2193_v13 = vpop.f32.mrf.mxu0 }
 0x2aa   :  { %v1869_v55 = vsub.f32 %v3264_v19, %v2193_v13 }
 0x2ab   :  { %v1486_v52 = vpop.f32.mrf.mxu0 }
 0x2ac   :  { %1933 = vst [vmem:[%s3890_s8 + $0x98] sm:$0xff] %v1869_v55  ;;  %v1868_v32 = vsub.f32 %v3256_v11, %v1486_v52 }
 0x2ae   :  { %1932 = vst [vmem:[%s3890_s8 + $0x90] sm:$0xff] %v1868_v32 }
 0x2b1   :  { %v2196_v58 = vpop.f32.mrf.mxu0 }
 0x2b2   :  { %v1871_v41 = vsub.f32 %v3280_v10, %v2196_v58 }
 0x2b3   :  { %v1496_v25 = vpop.f32.mrf.mxu0 }
 0x2b4   :  { %1935 = vst [vmem:[%s3890_s8 + $0xa8] sm:$0xff] %v1871_v41  ;;  %v1870_v19 = vsub.f32 %v3272_v27, %v1496_v25 }
 0x2b6   :  { %1934 = vst [vmem:[%s3890_s8 + $0xa0] sm:$0xff] %v1870_v19 }
 0x2b9   :  { %v2199_v6 = vpop.f32.mrf.mxu0 }
 0x2ba   :  { %v1873_v11 = vsub.f32 %v3296_v5, %v2199_v6 }
 0x2bb   :  { %v1506_v42 = vpop.f32.mrf.mxu0 }
 0x2bc   :  { %1937 = vst [vmem:[%s3890_s8 + $0xb8] sm:$0xff] %v1873_v11  ;;  %v1872_v10 = vsub.f32 %v3288_v36, %v1506_v42 }
 0x2be   :  { %1936 = vst [vmem:[%s3890_s8 + $0xb0] sm:$0xff] %v1872_v10 }
 0x2c1   :  { %v2202_v47 = vpop.f32.mrf.mxu0 }
 0x2c2   :  { %v1875_v27 = vsub.f32 %v3312_v57, %v2202_v47 }
 0x2c3   :  { %v1516_v17 = vpop.f32.mrf.mxu0 }
 0x2c4   :  { %1939 = vst [vmem:[%s3890_s8 + $0xc8] sm:$0xff] %v1875_v27  ;;  %v1874_v5 = vsub.f32 %v3304_v54, %v1516_v17 }
 0x2c6   :  { %1938 = vst [vmem:[%s3890_s8 + $0xc0] sm:$0xff] %v1874_v5 }
 0x2c9   :  { %v2205_v15 = vpop.f32.mrf.mxu0 }
 0x2ca   :  { %v1877_v36 = vsub.f32 %v3328_v61, %v2205_v15 }
 0x2cb   :  { %v1526_v34 = vpop.f32.mrf.mxu0 }
 0x2cc   :  { %1941 = vst [vmem:[%s3890_s8 + $0xd8] sm:$0xff] %v1877_v36  ;;  %v1876_v57 = vsub.f32 %v3320_v16, %v1526_v34 }
 0x2ce   :  { %1940 = vst [vmem:[%s3890_s8 + $0xd0] sm:$0xff] %v1876_v57 }
 0x2d1   :  { %v2208_v38 = vpop.f32.mrf.mxu0 }
 0x2d2   :  { %v1879_v54 = vsub.f32 %v3344_v18, %v2208_v38 }
 0x2d3   :  { %v1536_v46 = vpop.f32.mrf.mxu0 }
 0x2d4   :  { %1943 = vst [vmem:[%s3890_s8 + $0xe8] sm:$0xff] %v1879_v54  ;;  %v1878_v61 = vsub.f32 %v3336_v7, %v1536_v46 }
 0x2d6   :  { %1942 = vst [vmem:[%s3890_s8 + $0xe0] sm:$0xff] %v1878_v61 }
 0x2d9   :  { %v2211_v35 = vpop.f32.mrf.mxu0 }
 0x2da   :  { %v1881_v16 = vsub.f32 %v3360_v22, %v2211_v35 }
 0x2db   :  { %v1546_v59 = vpop.f32.mrf.mxu0 }
 0x2dc   :  { %1945 = vst [vmem:[%s3890_s8 + $0xf8] sm:$0xff] %v1881_v16  ;;  %v1880_v18 = vsub.f32 %v3352_v20, %v1546_v59 }
 0x2de   :  { %1944 = vst [vmem:[%s3890_s8 + $0xf0] sm:$0xff] %v1880_v18 }
 0x2e1   :  { %v2214_v21 = vpop.f32.mrf.mxu0 }
 0x2e2   :  { %v1883_v7 = vsub.f32 %v3376_v1, %v2214_v21 }
 0x2e3   :  { %v1556_v13 = vpop.f32.mrf.mxu0 }
 0x2e4   :  { %1947 = vst [vmem:[%s3890_s8 + $0x108] sm:$0xff] %v1883_v7  ;;  %v1882_v22 = vsub.f32 %v3368_v33, %v1556_v13 }
 0x2e6   :  { %1946 = vst [vmem:[%s3890_s8 + $0x100] sm:$0xff] %v1882_v22 }
 0x2e9   :  { %v2217_v55 = vpop.f32.mrf.mxu0 }
 0x2ea   :  { %v1885_v20 = vsub.f32 %v3392_v53, %v2217_v55 }
 0x2eb   :  { %v1566_v52 = vpop.f32.mrf.mxu0 }
 0x2ec   :  { %1949 = vst [vmem:[%s3890_s8 + $0x118] sm:$0xff] %v1885_v20  ;;  %v1884_v1 = vsub.f32 %v3384_v56, %v1566_v52 }
 0x2ee   :  { %1948 = vst [vmem:[%s3890_s8 + $0x110] sm:$0xff] %v1884_v1 }
 0x2f1   :  { %v2220_v32 = vpop.f32.mrf.mxu0 }
 0x2f2   :  { %v1887_v33 = vsub.f32 %v3408_v62, %v2220_v32 }
 0x2f3   :  { %v1576_v58 = vpop.f32.mrf.mxu0 }
 0x2f4   :  { %1951 = vst [vmem:[%s3890_s8 + $0x128] sm:$0xff] %v1887_v33  ;;  %v1886_v53 = vsub.f32 %v3400_v0, %v1576_v58 }
 0x2f6   :  { %1950 = vst [vmem:[%s3890_s8 + $0x120] sm:$0xff] %v1886_v53 }
 0x2f9   :  { %v2223_v41 = vpop.f32.mrf.mxu0 }
 0x2fa   :  { %v1889_v56 = vsub.f32 %v3424_v29, %v2223_v41 }
 0x2fb   :  { %v1586_v25 = vpop.f32.mrf.mxu0 }
 0x2fc   :  { %1953 = vst [vmem:[%s3890_s8 + $0x138] sm:$0xff] %v1889_v56  ;;  %v1888_v62 = vsub.f32 %v3416_v30, %v1586_v25 }
 0x2fe   :  { %1952 = vst [vmem:[%s3890_s8 + $0x130] sm:$0xff] %v1888_v62 }
 0x301   :  { %v2226_v19 = vpop.f32.mrf.mxu0 }
 0x302   :  { %v1891_v0 = vsub.f32 %v3440_v48, %v2226_v19 }
 0x303   :  { %v1596_v6 = vpop.f32.mrf.mxu0 }
 0x304   :  { %1955 = vst [vmem:[%s3890_s8 + $0x148] sm:$0xff] %v1891_v0  ;;  %v1890_v29 = vsub.f32 %v3432_v40, %v1596_v6 }
 0x306   :  { %1954 = vst [vmem:[%s3890_s8 + $0x140] sm:$0xff] %v1890_v29 }
 0x309   :  { %v2229_v11 = vpop.f32.mrf.mxu0 }
 0x30a   :  { %v1893_v30 = vsub.f32 %v3456_v14, %v2229_v11 }
 0x30b   :  { %v1606_v42 = vpop.f32.mrf.mxu0 }
 0x30c   :  { %1957 = vst [vmem:[%s3890_s8 + $0x158] sm:$0xff] %v1893_v30  ;;  %v1892_v48 = vsub.f32 %v3448_v12, %v1606_v42 }
 0x30e   :  { %1956 = vst [vmem:[%s3890_s8 + $0x150] sm:$0xff] %v1892_v48 }
 0x311   :  { %v2232_v10 = vpop.f32.mrf.mxu0 }
 0x312   :  { %v1895_v40 = vsub.f32 %v3472_v37, %v2232_v10 }
 0x313   :  { %v1616_v47 = vpop.f32.mrf.mxu0 }
 0x314   :  { %1959 = vst [vmem:[%s3890_s8 + $0x168] sm:$0xff] %v1895_v40  ;;  %v1894_v14 = vsub.f32 %v3464_v28, %v1616_v47 }
 0x316   :  { %1958 = vst [vmem:[%s3890_s8 + $0x160] sm:$0xff] %v1894_v14 }
 0x319   :  { %v2235_v27 = vpop.f32.mrf.mxu0 }
 0x31a   :  { %v1897_v12 = vsub.f32 %v3488_v60, %v2235_v27 }
 0x31b   :  { %v1626_v17 = vpop.f32.mrf.mxu0 }
 0x31c   :  { %1961 = vst [vmem:[%s3890_s8 + $0x178] sm:$0xff] %v1897_v12  ;;  %v1896_v37 = vsub.f32 %v3480_v45, %v1626_v17 }
 0x31e   :  { %1960 = vst [vmem:[%s3890_s8 + $0x170] sm:$0xff] %v1896_v37 }
 0x321   :  { %v2238_v5 = vpop.f32.mrf.mxu0 }
 0x322   :  { %v1899_v28 = vsub.f32 %v3504_v39, %v2238_v5 }
 0x323   :  { %v1636_v15 = vpop.f32.mrf.mxu0 }
 0x324   :  { %1963 = vst [vmem:[%s3890_s8 + $0x188] sm:$0xff] %v1899_v28  ;;  %v1898_v60 = vsub.f32 %v3496_v50, %v1636_v15 }
 0x326   :  { %1962 = vst [vmem:[%s3890_s8 + $0x180] sm:$0xff] %v1898_v60 }
 0x329   :  { %v2241_v36 = vpop.f32.mrf.mxu0 }
 0x32a   :  { %v1901_v45 = vsub.f32 %v3528_v31, %v2241_v36 }
 0x32b   :  { %v1646_v34 = vpop.f32.mrf.mxu0 }
 0x32c   :  { %1965 = vst [vmem:[%s3890_s8 + $0x198] sm:$0xff] %v1901_v45  ;;  %v1900_v39 = vsub.f32 %v3517_v8, %v1646_v34 }
 0x32e   :  { %1964 = vst [vmem:[%s3890_s8 + $0x190] sm:$0xff] %v1900_v39 }
 0x331   :  { %v2244_v57 = vpop.f32.mrf.mxu0 }
 0x332   :  { %v1903_v50 = vsub.f32 %v3552_v63, %v2244_v57 }
 0x333   :  { %v1656_v38 = vpop.f32.mrf.mxu0 }
 0x334   :  { %1967 = vst [vmem:[%s3890_s8 + $0x1a8] sm:$0xff] %v1903_v50  ;;  %v1902_v31 = vsub.f32 %v3541_v3, %v1656_v38 }
 0x336   :  { %1966 = vst [vmem:[%s3890_s8 + $0x1a0] sm:$0xff] %v1902_v31 }
 0x339   :  { %v2247_v54 = vpop.f32.mrf.mxu0 }
 0x33a   :  { %v1905_v8 = vsub.f32 %v3576_v26, %v2247_v54 }
 0x33b   :  { %v1666_v46 = vpop.f32.mrf.mxu0 }
 0x33c   :  { %1969 = vst [vmem:[%s3890_s8 + $0x1b8] sm:$0xff] %v1905_v8  ;;  %v1904_v63 = vsub.f32 %v3565_v51, %v1666_v46 }
 0x33e   :  { %1968 = vst [vmem:[%s3890_s8 + $0x1b0] sm:$0xff] %v1904_v63 }
 0x341   :  { %v2250_v61 = vpop.f32.mrf.mxu0 }
 0x342   :  { %v1907_v3 = vsub.f32 %v3600_v44, %v2250_v61 }
 0x343   :  { %v1676_v35 = vpop.f32.mrf.mxu0 }
 0x344   :  { %1971 = vst [vmem:[%s3890_s8 + $0x1c8] sm:$0xff] %v1907_v3  ;;  %v1906_v26 = vsub.f32 %v3589_v24, %v1676_v35 }
 0x346   :  { %1970 = vst [vmem:[%s3890_s8 + $0x1c0] sm:$0xff] %v1906_v26 }
 0x349   :  { %v2253_v16 = vpop.f32.mrf.mxu0 }
 0x34a   :  { %v1909_v51 = vsub.f32 %v3624_v4, %v2253_v16 }
 0x34b   :  { %v1686_v59 = vpop.f32.mrf.mxu0 }
 0x34c   :  { %1973 = vst [vmem:[%s3890_s8 + $0x1d8] sm:$0xff] %v1909_v51  ;;  %v1908_v44 = vsub.f32 %v3613_v43, %v1686_v59 }
 0x34e   :  { %1972 = vst [vmem:[%s3890_s8 + $0x1d0] sm:$0xff] %v1908_v44 }
 0x351   :  { %v2256_v18 = vpop.f32.mrf.mxu0 }
 0x352   :  { %v1911_v24 = vsub.f32 %v3648_v2, %v2256_v18 }
 0x353   :  { %v1696_v21 = vpop.f32.mrf.mxu0 }
 0x354   :  { %1975 = vst [vmem:[%s3890_s8 + $0x1e8] sm:$0xff] %v1911_v24  ;;  %v1910_v4 = vsub.f32 %v3637_v23, %v1696_v21 }
 0x356   :  { %1974 = vst [vmem:[%s3890_s8 + $0x1e0] sm:$0xff] %v1910_v4 }
 0x359   :  { %v2259_v7 = vpop.f32.mrf.mxu0 }
 0x35a   :  { %v1913_v43 = vsub.f32 %v3676_v9, %v2259_v7 }
 0x35b   :  { %v1706_v13 = vpop.f32.mrf.mxu0 }
 0x35c   :  { %1977 = vst [vmem:[%s3890_s8 + $0x1f8] sm:$0xff] %v1913_v43  ;;  %v1912_v2 = vsub.f32 %v3661_v49, %v1706_v13 }
 0x35e   :  { %1976 = vst [vmem:[%s3890_s8 + $0x1f0] sm:$0xff] %v1912_v2 }

</bundles_post_ra>
